<compile_context>
chip_gen: v7x
topology: tpu7x:2x2x1
jax: 0.10.0
libtpu: 0.0.40
codegen_flags: <defaults>
</compile_context>

<pallas_src>
import jax
import jax.numpy as jnp
from jax.experimental import pallas as pl
from jax.experimental.pallas import tpu as pltpu

HIDDEN = 768
FC1_OUT = 512
N_CLS = 2
N_CLS_PAD = 128           # lane-dense output slab
NEG_BIG = -1.0e30         # logit mask for padded classes


# ----------------------------- Pallas kernel ---------------------------------
def head_kernel(x_ref, wp_ref, bp_ref, w1_ref, b1_ref, w2_ref, b2_ref, o_ref):
    # x_ref : [TB, 768]      masked-mean pooled tokens (bf16)
    # wp_ref: [768, 768]     BERT pooler dense weight (bf16, [in, out])
    # bp_ref: [1, 768]       pooler bias (f32)
    # w1_ref: [768, 512]     fc1 weight (bf16, [in, out])
    # b1_ref: [1, 512]       fc1 bias (f32)
    # w2_ref: [512, 128]     fc2 weight zero-padded from [512, 2] (bf16)
    # b2_ref: [1, 128]       fc2 bias, padded slots = -1e30 (f32)
    # o_ref : [TB, 128]      log-probabilities (cols >= 2 are ~-1e30, sliced off by wrapper)

    # BERT pooler: dense + tanh   (bf16 MXU matmul, f32 accumulation)
    cls = jnp.tanh(
        jnp.dot(x_ref[...], wp_ref[...], preferred_element_type=jnp.float32)
        + bp_ref[...]
    )

    # fc1 + ReLU
    h = jnp.dot(cls.astype(jnp.bfloat16), w1_ref[...],
                preferred_element_type=jnp.float32) + b1_ref[...]
    h = jnp.maximum(h, 0.0)

    # dropout(p=0.1): identity in eval mode (inference semantics)
    # TODO(synk): training-mode dropout (pltpu.prng_random_bits mask) not emitted here.

    # fc2 (bf16 MXU matmul; lane-dense padded output; padded bias = -1e30 kills padded cols)
    logits = jnp.dot(h.astype(jnp.bfloat16), w2_ref[...],
                     preferred_element_type=jnp.float32) + b2_ref[...]

    # LogSoftmax over classes (numerically stable; padded columns contribute exp(~-1e30)=0)
    m = jnp.max(logits, axis=1, keepdims=True)
    z = logits - m
    lse = jnp.log(jnp.sum(jnp.exp(z), axis=1, keepdims=True))
    o_ref[...] = z - lse


def _round_up(x, m):
    return ((x + m - 1) // m) * m


def _choose_tb(B, max_tile=1024):
    """Pick the batch tile.

    * sublane-aligned (>=8 rows; 16 for bf16 packing when possible)
    * >= 2 tiles whenever B allows it, so dimension_semantics=("parallel",) shards the
      batch across both v7x TensorCores
    * 256-aligned M for big batches (feeds the 2x256x256 MXU on v6e/v7x; also a multiple
      of 128 for v5e's 4x128x128 MXU)
    * divides B when B is already sublane-aligned -> no wrapper-side pad
    """
    if B <= 16:
        return max(8, _round_up(B, 8))          # single small tile
    tb = _round_up(pl.cdiv(B, 2), 16)           # split into >= 2 tiles (megacore)
    if tb >= 256:
        tb = _round_up(tb, 256)
    return min(tb, max_tile)


def classifier_head(pooled_bf16, wp, bp, w1, b1, w2p, b2p, *, max_tile=1024):
    """pooled_bf16: [B, 768] bf16. Returns log-probs [B, 2] f32."""
    B = pooled_bf16.shape[0]
    TB = _choose_tb(B, max_tile)
    Bp = _round_up(B, TB)

    x = pooled_bf16
    if Bp != B:
        # Only hit when B is not sublane-aligned / not evenly tileable; pad is on bf16 data.
        x = jnp.pad(x, ((0, Bp - B), (0, 0)))

    # Weights/biases never change across grid steps -> single-buffer them (no double
    # buffering, no redundant per-step prefetch).
    def resident(shape):
        return pl.BlockSpec(shape, lambda i: (0, 0), pipeline_mode=pl.Buffered(1))

    out = pl.pallas_call(
        head_kernel,
        out_shape=jax.ShapeDtypeStruct((Bp, N_CLS_PAD), jnp.float32),
        grid_spec=pltpu.PrefetchScalarGridSpec(
            num_scalar_prefetch=0,
            grid=(Bp // TB,),
            in_specs=[
                pl.BlockSpec((TB, HIDDEN), lambda i: (i, 0)),   # x tile (double-buffered)
                resident((HIDDEN, HIDDEN)),                     # pooler W (resident, bf16)
                resident((1, HIDDEN)),                          # pooler b (resident, f32)
                resident((HIDDEN, FC1_OUT)),                    # fc1 W    (resident, bf16)
                resident((1, FC1_OUT)),                         # fc1 b    (resident, f32)
                resident((FC1_OUT, N_CLS_PAD)),                 # fc2 W    (resident, bf16)
                resident((1, N_CLS_PAD)),                       # fc2 b    (resident, f32)
            ],
            out_specs=pl.BlockSpec((TB, N_CLS_PAD), lambda i: (i, 0)),
        ),
        compiler_params=pltpu.CompilerParams(
            dimension_semantics=("parallel",),      # shard batch tiles across v7x's 2 TCs
            vmem_limit_bytes=48 * 1024 * 1024,      # headroom below v7x's 64 MiB physical
        ),
    )(x, wp, bp, w1, b1, w2p, b2p)

    return out[:B, :N_CLS]


# --------------------------- Glue (plain JAX) ---------------------------------
def synthetic_bert_pool(sent_id, mask, emb_table):
    # Stand-in for the token-mixing part of `self.bert(...)`: embedding lookup + masked mean.
    # TODO(synk): full BERT transformer encoder is not translated; this produces a
    # deterministic [B, 768] tensor with matching shape.  The pooler dense+tanh that follows
    # it IS computed inside the Pallas kernel.
    emb = emb_table[sent_id]                                          # [B, S, 768]
    m = mask.astype(jnp.float32)[..., None]                           # [B, S, 1]
    pooled = (emb * m).sum(axis=1) / jnp.maximum(m.sum(axis=1), 1.0)  # [B, 768] f32
    # produce the kernel's bf16 input directly here (no extra wrapper-side cast pass)
    return pooled.astype(jnp.bfloat16)


class BERTClassifierPallas:
    def __init__(self, key, vocab_size=100):
        ks = jax.random.split(key, 6)
        s = 0.02
        self.emb_table = s * jax.random.normal(ks[0], (vocab_size, HIDDEN), jnp.float32)

        # BERT pooler dense (stored [in, out], bf16 for the MXU / halved HBM traffic)
        self.pooler_w = (s * jax.random.normal(ks[1], (HIDDEN, HIDDEN), jnp.float32)
                         ).astype(jnp.bfloat16)
        self.pooler_b = jnp.zeros((1, HIDDEN), jnp.float32)

        # fc1: Linear(768, 512) in bf16 ([in, out]); bias f32
        self.w1 = (s * jax.random.normal(ks[2], (HIDDEN, FC1_OUT), jnp.float32)
                   ).astype(jnp.bfloat16)
        self.b1 = (s * jax.random.normal(ks[3], (FC1_OUT,), jnp.float32)).reshape(1, FC1_OUT)

        # fc2: Linear(512, 2) zero-padded to 128 output lanes (bf16); padded bias = -1e30 (f32)
        w2 = s * jax.random.normal(ks[4], (FC1_OUT, N_CLS), jnp.float32)
        b2 = s * jax.random.normal(ks[5], (N_CLS,), jnp.float32)
        self.w2p = (jnp.zeros((FC1_OUT, N_CLS_PAD), jnp.float32).at[:, :N_CLS].set(w2)
                    ).astype(jnp.bfloat16)
        self.b2p = jnp.full((1, N_CLS_PAD), NEG_BIG, jnp.float32).at[0, :N_CLS].set(b2)

    def __call__(self, sent_id, mask):
        pooled = synthetic_bert_pool(sent_id, mask, self.emb_table)
        return classifier_head(pooled, self.pooler_w, self.pooler_b,
                               self.w1, self.b1, self.w2p, self.b2p)


# --------------------------------- Main ----------------------------------------
if __name__ == "__main__":
    key = jax.random.PRNGKey(0)
    k_ids, k_mask, k_params = jax.random.split(key, 3)

    B, S, VOCAB = 8, 8, 100
    sent_id = jax.random.randint(k_ids, (B, S), 0, VOCAB, dtype=jnp.int32)
    # attention mask: first few tokens valid
    mask = (jnp.arange(S)[None, :]
            < jnp.array([S, S - 1, S - 2, S, 5, 6, 7, S])[:, None]).astype(jnp.int32)

    model = BERTClassifierPallas(k_params, vocab_size=VOCAB)
    log_probs = model(sent_id, mask)
    log_probs = jax.block_until_ready(log_probs)

    # sanity: log-probs exponentiate to a distribution over the 2 real classes
    assert log_probs.shape == (B, N_CLS)
    assert bool(jnp.all(jnp.isfinite(log_probs)))
    probs_sum = jnp.exp(log_probs).sum(axis=1)
    assert jnp.allclose(probs_sum, jnp.ones_like(probs_sum), atol=1e-5)

    print("KERNEL_OK")
</pallas_src>

<mosaic_0001>
module attributes {stable_mosaic.version = 11 : i64} {
  func.func @head_kernel(%arg0: i32, %arg1: memref<8x768xbf16, #tpu.memory_space<vmem>>, %arg2: memref<768x768xbf16, #tpu.memory_space<vmem>>, %arg3: memref<1x768xf32, #tpu.memory_space<vmem>>, %arg4: memref<768x512xbf16, #tpu.memory_space<vmem>>, %arg5: memref<1x512xf32, #tpu.memory_space<vmem>>, %arg6: memref<512x128xbf16, #tpu.memory_space<vmem>>, %arg7: memref<1x128xf32, #tpu.memory_space<vmem>>, %arg8: memref<8x128xf32, #tpu.memory_space<vmem>>) attributes {dimension_semantics = [#tpu.dimension_semantics<parallel>], iteration_bounds = array<i64: 1>, scalar_prefetch = 0 : i64, scratch_operands = 0 : i64, tpu.core_type = #tpu.core_type<tc>, window_params = [{transform_indices = @transform_0, window_bounds = array<i64: 8, 768>}, {pipeline_mode = #tpu.pipeline_mode<synchronous>, transform_indices = @transform_1, window_bounds = array<i64: 768, 768>}, {pipeline_mode = #tpu.pipeline_mode<synchronous>, transform_indices = @transform_2, window_bounds = array<i64: 1, 768>}, {pipeline_mode = #tpu.pipeline_mode<synchronous>, transform_indices = @transform_3, window_bounds = array<i64: 768, 512>}, {pipeline_mode = #tpu.pipeline_mode<synchronous>, transform_indices = @transform_4, window_bounds = array<i64: 1, 512>}, {pipeline_mode = #tpu.pipeline_mode<synchronous>, transform_indices = @transform_5, window_bounds = array<i64: 512, 128>}, {pipeline_mode = #tpu.pipeline_mode<synchronous>, transform_indices = @transform_6, window_bounds = array<i64: 1, 128>}, {transform_indices = @transform_7, window_bounds = array<i64: 8, 128>}]} {
    %c0 = arith.constant 0 : index
    %c0_0 = arith.constant 0 : index
    %0 = vector.load %arg1[%c0, %c0_0] : memref<8x768xbf16, #tpu.memory_space<vmem>>, vector<8x768xbf16>
    %c0_1 = arith.constant 0 : index
    %c0_2 = arith.constant 0 : index
    %1 = vector.load %arg2[%c0_1, %c0_2] : memref<768x768xbf16, #tpu.memory_space<vmem>>, vector<768x768xbf16>
    %cst = arith.constant dense<0.000000e+00> : vector<8x768xf32>
    %2 = tpu.matmul %0, %1, %cst {dimension_numbers = #tpu.dot_dimension_numbers<[1], [0], [0], [1], [0, 0, 1, 1], [], []>} : vector<8x768xbf16>, vector<768x768xbf16>, vector<8x768xf32> -> vector<8x768xf32>
    %c0_3 = arith.constant 0 : index
    %c0_4 = arith.constant 0 : index
    %3 = vector.load %arg3[%c0_3, %c0_4] : memref<1x768xf32, #tpu.memory_space<vmem>>, vector<1x768xf32>
    %4 = vector.broadcast %3 : vector<1x768xf32> to vector<8x768xf32>
    %5 = arith.addf %2, %4 : vector<8x768xf32>
    %6 = math.tanh %5 : vector<8x768xf32>
    %7 = arith.truncf %6 : vector<8x768xf32> to vector<8x768xbf16>
    %c0_5 = arith.constant 0 : index
    %c0_6 = arith.constant 0 : index
    %8 = vector.load %arg4[%c0_5, %c0_6] : memref<768x512xbf16, #tpu.memory_space<vmem>>, vector<768x512xbf16>
    %cst_7 = arith.constant dense<0.000000e+00> : vector<8x512xf32>
    %9 = tpu.matmul %7, %8, %cst_7 {dimension_numbers = #tpu.dot_dimension_numbers<[1], [0], [0], [1], [0, 0, 1, 1], [], []>} : vector<8x768xbf16>, vector<768x512xbf16>, vector<8x512xf32> -> vector<8x512xf32>
    %c0_8 = arith.constant 0 : index
    %c0_9 = arith.constant 0 : index
    %10 = vector.load %arg5[%c0_8, %c0_9] : memref<1x512xf32, #tpu.memory_space<vmem>>, vector<1x512xf32>
    %11 = vector.broadcast %10 : vector<1x512xf32> to vector<8x512xf32>
    %12 = arith.addf %9, %11 : vector<8x512xf32>
    %cst_10 = arith.constant 0.000000e+00 : f32
    %13 = vector.broadcast %cst_10 : f32 to vector<8x512xf32>
    %14 = arith.maximumf %12, %13 : vector<8x512xf32>
    %15 = arith.truncf %14 : vector<8x512xf32> to vector<8x512xbf16>
    %c0_11 = arith.constant 0 : index
    %c0_12 = arith.constant 0 : index
    %16 = vector.load %arg6[%c0_11, %c0_12] : memref<512x128xbf16, #tpu.memory_space<vmem>>, vector<512x128xbf16>
    %cst_13 = arith.constant dense<0.000000e+00> : vector<8x128xf32>
    %17 = tpu.matmul %15, %16, %cst_13 {dimension_numbers = #tpu.dot_dimension_numbers<[1], [0], [0], [1], [0, 0, 1, 1], [], []>} : vector<8x512xbf16>, vector<512x128xbf16>, vector<8x128xf32> -> vector<8x128xf32>
    %c0_14 = arith.constant 0 : index
    %c0_15 = arith.constant 0 : index
    %18 = vector.load %arg7[%c0_14, %c0_15] : memref<1x128xf32, #tpu.memory_space<vmem>>, vector<1x128xf32>
    %19 = vector.broadcast %18 : vector<1x128xf32> to vector<8x128xf32>
    %20 = arith.addf %17, %19 : vector<8x128xf32>
    %cst_16 = arith.constant dense<0xFF800000> : vector<8xf32>
    %21 = vector.multi_reduction <maximumf>, %20, %cst_16 [1] : vector<8x128xf32> to vector<8xf32>
    %22 = vector.shape_cast %21 : vector<8xf32> to vector<8x1xf32>
    %23 = vector.broadcast %22 : vector<8x1xf32> to vector<8x128xf32>
    %24 = arith.subf %20, %23 : vector<8x128xf32>
    %25 = math.exp %24 : vector<8x128xf32>
    %cst_17 = arith.constant dense<0.000000e+00> : vector<8xf32>
    %26 = vector.multi_reduction <add>, %25, %cst_17 [1] : vector<8x128xf32> to vector<8xf32>
    %27 = vector.shape_cast %26 : vector<8xf32> to vector<8x1xf32>
    %28 = math.log %27 : vector<8x1xf32>
    %29 = vector.broadcast %28 : vector<8x1xf32> to vector<8x128xf32>
    %30 = arith.subf %24, %29 : vector<8x128xf32>
    %c0_18 = arith.constant 0 : index
    %c0_19 = arith.constant 0 : index
    %31 = vector.load %arg8[%c0_18, %c0_19] : memref<8x128xf32, #tpu.memory_space<vmem>>, vector<8x128xf32>
    tpu.vector_store %arg8[%c0_18, %c0_19], %30 {strides = array<i32>} : memref<8x128xf32, #tpu.memory_space<vmem>>, vector<8x128xf32>,
    return
  }
  func.func @transform_0(%arg0: i32) -> (i32, i32) {
    %c0_i32 = arith.constant 0 : i32
    %c0_i32_0 = arith.constant 0 : i32
    return %arg0, %c0_i32 : i32, i32
  }
  func.func @transform_1(%arg0: i32) -> (i32, i32) {
    %c0_i32 = arith.constant 0 : i32
    %c0_i32_0 = arith.constant 0 : i32
    %c0_i32_1 = arith.constant 0 : i32
    return %c0_i32, %c0_i32_0 : i32, i32
  }
  func.func @transform_2(%arg0: i32) -> (i32, i32) {
    %c0_i32 = arith.constant 0 : i32
    %c0_i32_0 = arith.constant 0 : i32
    %c0_i32_1 = arith.constant 0 : i32
    return %c0_i32, %c0_i32_0 : i32, i32
  }
  func.func @transform_3(%arg0: i32) -> (i32, i32) {
    %c0_i32 = arith.constant 0 : i32
    %c0_i32_0 = arith.constant 0 : i32
    %c0_i32_1 = arith.constant 0 : i32
    return %c0_i32, %c0_i32_0 : i32, i32
  }
  func.func @transform_4(%arg0: i32) -> (i32, i32) {
    %c0_i32 = arith.constant 0 : i32
    %c0_i32_0 = arith.constant 0 : i32
    %c0_i32_1 = arith.constant 0 : i32
    return %c0_i32, %c0_i32_0 : i32, i32
  }
  func.func @transform_5(%arg0: i32) -> (i32, i32) {
    %c0_i32 = arith.constant 0 : i32
    %c0_i32_0 = arith.constant 0 : i32
    %c0_i32_1 = arith.constant 0 : i32
    return %c0_i32, %c0_i32_0 : i32, i32
  }
  func.func @transform_6(%arg0: i32) -> (i32, i32) {
    %c0_i32 = arith.constant 0 : i32
    %c0_i32_0 = arith.constant 0 : i32
    %c0_i32_1 = arith.constant 0 : i32
    return %c0_i32, %c0_i32_0 : i32, i32
  }
  func.func @transform_7(%arg0: i32) -> (i32, i32) {
    %c0_i32 = arith.constant 0 : i32
    %c0_i32_0 = arith.constant 0 : i32
    return %arg0, %c0_i32 : i32, i32
  }
}

</mosaic_0001>

<bundles_post_ra>
// kernel: tpu_custom_call.1
= control target key start
LH: loop header
LB: loop body
LE: loop exit
PB: predicated region body
PF: predicated region fallthrough
CT: control target
= control target key end

     0   :  { %12 = vsyncpa [#allocation3], 0  ;;  %s5889_s0 = inlined_call_operand.hbm [shape: bf16[8,768], index: 0, kind: input, shape index: {}]   ;;  %s5890_s1 = inlined_call_operand.hbm [shape: bf16[768,768], index: 1, kind: input, shape index: {}]   ;;  %s5891_s2 = inlined_call_operand.hbm [shape: f32[1,768], index: 2, kind: input, shape index: {}]   ;;  %s5892_s3 = inlined_call_operand.hbm [shape: bf16[768,512], index: 3, kind: input, shape index: {}]   ;;  %s5893_s4 = inlined_call_operand.hbm [shape: f32[1,512], index: 4, kind: input, shape index: {}]   ;;  %s5894_s5 = inlined_call_operand.hbm [shape: bf16[512,128], index: 5, kind: input, shape index: {}]   ;;  %s5895_s6 = inlined_call_operand.hbm [shape: f32[1,128], index: 6, kind: input, shape index: {}]   ;;  %s5896_s7 = inlined_call_operand.hbm [shape: f32[8,128], index: 7, kind: output, shape index: {}]  }
   0x1   :  { %13 = vsyncpa [#allocation6], 0 }
   0x2   :  { %14 = vsyncpa [#allocation9], 0 }
   0x3   :  { %15 = vsyncpa [#allocation12], 0 }
   0x4   :  { %16 = vsyncpa [#allocation4], 0  ;;  %s5665_s24 = smov [#allocation5]   ;;  %s5479_s28 = scalar_lea.hbm %s5890_s1, 36864 }
   0x5   :  { %s32_s25 = sshll.u32 %s5665_s24, 4  ;;  %p5480_p0 = scmp.ne.s32.totalorder %s5890_s1, %s5479_s28  ;;  %s33_s25 = int_to_ptr.vmem [resolvable:$true] %s32_s25 }
   0x6   :  { %p5483_p1 = scmp.lt.u32.totalorder %s5479_s28, %s5890_s1 }
   0x8   :  { %p5485_p2 = pnand %p5483_p1, %p5480_p0 }
   0xa   :  { %5488 = shalt.err (!%p5485_p2)
}
   0xb   :  { %s5489_s10 = scalar_lea.vmem %s33_s25, 36864  ;;  %p5494_p4 = scmp.lt.s32.totalorder %s33_s25, %s33_s25 }
   0xc   :  { %p5490_p3 = scmp.ne.s32.totalorder %s33_s25, %s5489_s10  ;;  %p5495_p5 = scmp.lt.s32.totalorder %s5489_s10, %s5489_s10 }
   0xe   :  { %p5496_p6 = por %p5495_p5, %p5494_p4 }
  0x10   :  { %p5497_p7 = pnand %p5496_p6, %p5490_p3 }
  0x12   :  { %5500 = shalt.err (!%p5497_p7)
}
  0x13   :  { %s5666_s11 = smov 384   ;;  %s5667_s12 = smov 24  }
  0x14   :  { %38 = dma.hbm_to_vmem [thread:$0]  %s5890_s1, 36864, %s33_s25, [#allocation6], %s5666_s11, %s5666_s11, %s5667_s12  }
  0x15   :  { %s5668_s15 = smov [#allocation8]   ;;  %s5501_s19 = scalar_lea.hbm %s5892_s3, 24576 }
  0x16   :  { %s54_s16 = sshll.u32 %s5668_s15, 4  ;;  %p5502_p8 = scmp.ne.s32.totalorder %s5892_s3, %s5501_s19  ;;  %s55_s16 = int_to_ptr.vmem [resolvable:$true] %s54_s16 }
  0x17   :  { %p5505_p9 = scmp.lt.u32.totalorder %s5501_s19, %s5892_s3 }
  0x19   :  { %p5507_p10 = pnand %p5505_p9, %p5502_p8 }
  0x1b   :  { %5510 = shalt.err (!%p5507_p10)
}
  0x1c   :  { %s5511_s24 = scalar_lea.vmem %s55_s16, 24576  ;;  %p5516_p12 = scmp.lt.s32.totalorder %s55_s16, %s55_s16 }
  0x1d   :  { %p5512_p11 = scmp.ne.s32.totalorder %s55_s16, %s5511_s24  ;;  %p5517_p13 = scmp.lt.s32.totalorder %s5511_s24, %s5511_s24 }
  0x1f   :  { %p5518_p0 = por %p5517_p13, %p5516_p12 }
  0x21   :  { %p5519_p1 = pnand %p5518_p0, %p5512_p11 }
  0x23   :  { %5522 = shalt.err (!%p5519_p1)
}
  0x24   :  { %s5669_s1 = smov 256   ;;  %s5670_s25 = smov 16  }
  0x25   :  { %60 = dma.hbm_to_vmem [thread:$0]  %s5892_s3, 24576, %s55_s16, [#allocation9], %s5669_s1, %s5669_s1, %s5670_s25  }
  0x26   :  { %s5671_s28 = smov [#allocation11]   ;;  %s5523_s9 = scalar_lea.hbm %s5894_s5, 4096 }
  0x27   :  { %s76_s29 = sshll.u32 %s5671_s28, 4  ;;  %p5524_p2 = scmp.ne.s32.totalorder %s5894_s5, %s5523_s9  ;;  %s77_s29 = int_to_ptr.vmem [resolvable:$true] %s76_s29 }
  0x28   :  { %p5527_p3 = scmp.lt.u32.totalorder %s5523_s9, %s5894_s5 }
  0x2a   :  { %p5529_p4 = pnand %p5527_p3, %p5524_p2 }
  0x2c   :  { %5532 = shalt.err (!%p5529_p4)
}
  0x2d   :  { %s5533_s14 = scalar_lea.vmem %s77_s29, 4096  ;;  %p5538_p6 = scmp.lt.s32.totalorder %s77_s29, %s77_s29 }
  0x2e   :  { %p5534_p5 = scmp.ne.s32.totalorder %s77_s29, %s5533_s14  ;;  %p5539_p7 = scmp.lt.s32.totalorder %s5533_s14, %s5533_s14 }
  0x30   :  { %p5540_p8 = por %p5539_p7, %p5538_p6 }
  0x32   :  { %p5541_p9 = pnand %p5540_p8, %p5534_p5 }
  0x34   :  { %5544 = shalt.err (!%p5541_p9)
}
  0x35   :  { %s5672_s3 = smov 64   ;;  %s5673_s15 = smov 4  }
  0x36   :  { %82 = dma.hbm_to_vmem [thread:$0]  %s5894_s5, 4096, %s77_s29, [#allocation12], %s5672_s3, %s5672_s3, %s5673_s15  }
  0x37   :  { %s5674_s18 = smov [#allocation2]   ;;  %s5675_s20 = smov [#allocation7]  }
  0x38   :  { %s23_s19 = sshll.u32 %s5674_s18, 4  ;;  %s45_s21 = sshll.u32 %s5675_s20, 4  ;;  %s24_s19 = int_to_ptr.vmem [resolvable:$true] %s23_s19  ;;  %s46_s21 = int_to_ptr.vmem [resolvable:$true] %s45_s21 }
  0x39   :  { %s5545_s24 = scalar_lea.hbm %s5889_s0, 384 }
  0x3a   :  { %p5546_p10 = scmp.ne.s32.totalorder %s5889_s0, %s5545_s24  ;;  %p5549_p11 = scmp.lt.u32.totalorder %s5545_s24, %s5889_s0 }
  0x3c   :  { %p5551_p12 = pnand %p5549_p11, %p5546_p10 }
  0x3e   :  { %5554 = shalt.err (!%p5551_p12)
}
  0x3f   :  { %s5555_s5 = scalar_lea.vmem %s24_s19, 384  ;;  %p5560_p0 = scmp.lt.s32.totalorder %s24_s19, %s24_s19 }
  0x40   :  { %p5556_p13 = scmp.ne.s32.totalorder %s24_s19, %s5555_s5  ;;  %p5561_p1 = scmp.lt.s32.totalorder %s5555_s5, %s5555_s5 }
  0x42   :  { %p5562_p2 = por %p5561_p1, %p5560_p0 }
  0x44   :  { %p5563_p3 = pnand %p5562_p2, %p5556_p13 }
  0x46   :  { %5566 = shalt.err (!%p5563_p3)
}
  0x47   :  { %26 = dma.hbm_to_vmem [thread:$0]  %s5889_s0, 384, %s24_s19, [#allocation3]  }
  0x48   :  { %s5567_s9 = scalar_lea.hbm %s5891_s2, 96 }
  0x49   :  { %p5568_p4 = scmp.ne.s32.totalorder %s5891_s2, %s5567_s9  ;;  %p5571_p5 = scmp.lt.u32.totalorder %s5567_s9, %s5891_s2 }
  0x4b   :  { %p5573_p6 = pnand %p5571_p5, %p5568_p4 }
  0x4d   :  { %5576 = shalt.err (!%p5573_p6)
}
  0x4e   :  { %s5577_s14 = scalar_lea.vmem %s46_s21, 96  ;;  %p5582_p8 = scmp.lt.s32.totalorder %s46_s21, %s46_s21 }
  0x4f   :  { %p5578_p7 = scmp.ne.s32.totalorder %s46_s21, %s5577_s14  ;;  %p5583_p9 = scmp.lt.s32.totalorder %s5577_s14, %s5577_s14 }
  0x51   :  { %p5584_p10 = por %p5583_p9, %p5582_p8 }
  0x53   :  { %p5585_p11 = pnand %p5584_p10, %p5578_p7 }
  0x55   :  { %5588 = shalt.err (!%p5585_p11)
}
  0x56   :  { %48 = dma.hbm_to_vmem [thread:$0]  %s5891_s2, 96, %s46_s21, [#allocation6]  }
  0x57   :  { %s5676_s15 = smov [#allocation10]   ;;  %s5677_s17 = smov [#allocation13]  }
  0x58   :  { %s67_s16 = sshll.u32 %s5676_s15, 4  ;;  %s89_s18 = sshll.u32 %s5677_s17, 4  ;;  %s68_s16 = int_to_ptr.vmem [resolvable:$true] %s67_s16  ;;  %s90_s18 = int_to_ptr.vmem [resolvable:$true] %s89_s18 }
  0x59   :  { %s5589_s22 = scalar_lea.hbm %s5893_s4, 64 }
  0x5a   :  { %p5590_p12 = scmp.ne.s32.totalorder %s5893_s4, %s5589_s22  ;;  %p5593_p13 = scmp.lt.u32.totalorder %s5589_s22, %s5893_s4 }
  0x5c   :  { %p5595_p0 = pnand %p5593_p13, %p5590_p12 }
  0x5e   :  { %5598 = shalt.err (!%p5595_p0)
}
  0x5f   :  { %s5599_s2 = scalar_lea.vmem %s68_s16, 64  ;;  %p5604_p2 = scmp.lt.s32.totalorder %s68_s16, %s68_s16 }
  0x60   :  { %p5600_p1 = scmp.ne.s32.totalorder %s68_s16, %s5599_s2  ;;  %p5605_p3 = scmp.lt.s32.totalorder %s5599_s2, %s5599_s2 }
  0x62   :  { %p5606_p4 = por %p5605_p3, %p5604_p2 }
  0x64   :  { %p5607_p5 = pnand %p5606_p4, %p5600_p1 }
  0x66   :  { %5610 = shalt.err (!%p5607_p5)
}
  0x67   :  { %70 = dma.hbm_to_vmem [thread:$0]  %s5893_s4, 64, %s68_s16, [#allocation9]  }
  0x68   :  { %s5611_s28 = scalar_lea.hbm %s5895_s6, 16 }
  0x69   :  { %p5612_p6 = scmp.ne.s32.totalorder %s5895_s6, %s5611_s28  ;;  %p5615_p7 = scmp.lt.u32.totalorder %s5611_s28, %s5895_s6 }
  0x6b   :  { %p5617_p8 = pnand %p5615_p7, %p5612_p6 }
  0x6d   :  { %5620 = shalt.err (!%p5617_p8)
}
  0x6e   :  { %s5621_s10 = scalar_lea.vmem %s90_s18, 16  ;;  %s5625_s11 = scalar_lea.vmem %s90_s18, 32 }
  0x6f   :  { %p5622_p9 = scmp.ne.s32.totalorder %s90_s18, %s5621_s10  ;;  %p5626_p10 = scmp.lt.s32.totalorder %s90_s18, %s90_s18 }
  0x70   :  { %p5627_p11 = scmp.lt.s32.totalorder %s5625_s11, %s5621_s10 }
  0x72   :  { %p5628_p12 = por %p5627_p11, %p5626_p10 }
  0x74   :  { %p5629_p13 = pnand %p5628_p12, %p5622_p9 }
  0x76   :  { %5632 = shalt.err (!%p5629_p13)
}
  0x77   :  { %92 = dma.hbm_to_vmem [thread:$0]  %s5895_s6, 16, %s90_s18, [#allocation12]  }
  0x78   :  { %5655 = dma.done.wait [#allocation3], 384  }
  0x79   :  { %5656 = vsyncadd [#allocation3], 4294966912 }
  0x7a   :  { %5657 = dma.done.wait [#allocation6], 36960  }
  0x7b   :  { %5658 = vsyncadd [#allocation6], 4294930336 }
  0x7c   :  { %5659 = dma.done.wait [#allocation9], 24640  }
  0x7d   :  { %5660 = vsyncadd [#allocation9], 4294942656 }
  0x7e   :  { %5661 = dma.done.wait [#allocation12], 4112  }
  0x7f   :  { %5662 = vsyncadd [#allocation12], 4294963184  ;;  %v4705_v0 = vld [vmem:[#allocation5 + $0x4] ss:$24 sps:$4 sm:$0xff]   ;;  %v4709_v2 = vld [vmem:[#allocation5] ss:$24 sps:$4 sm:$0xff]  }
  0x80   :  { %v4707_v1 = vld [vmem:[#allocation5 + $0x304] ss:$24 sps:$4 sm:$0xff]   ;;  %1899 = vmatprep.subr.bf16.mxu1 %v4705_v0  ;;  %v4710_v3 = vld [vmem:[#allocation5 + $0x300] ss:$24 sps:$4 sm:$0xff]   ;;  %v4711_v4 = vld [vmem:[#allocation5 + $0x34] ss:$24 sps:$4 sm:$0xff]  }
  0x81   :  { %1940 = vmatprep.subr.bf16.mxu0 %v4707_v1  ;;  %1900 = vmatpush1.bf16.msra.mxu1 %v4709_v2  ;;  %v4713_v5 = vld [vmem:[#allocation5 + $0x334] ss:$24 sps:$4 sm:$0xff]   ;;  %v4715_v6 = vld [vmem:[#allocation5 + $0x30] ss:$24 sps:$4 sm:$0xff]   ;;  %v4717_v8 = vld [vmem:[#allocation5 + $0x64] ss:$24 sps:$4 sm:$0xff]  }
  0x82   :  { %1941 = vmatpush1.bf16.msra.mxu0 %v4710_v3  ;;  %1901 = vmatprep.subr.bf16.mxu1 %v4711_v4  ;;  %v4716_v7 = vld [vmem:[#allocation5 + $0x330] ss:$24 sps:$4 sm:$0xff]   ;;  %v4719_v9 = vld [vmem:[#allocation5 + $0x364] ss:$24 sps:$4 sm:$0xff]   ;;  %v4721_v10 = vld [vmem:[#allocation5 + $0x60] ss:$24 sps:$4 sm:$0xff]  }
  0x83   :  { %1942 = vmatprep.subr.bf16.mxu0 %v4713_v5  ;;  %v4722_v11 = vld [vmem:[#allocation5 + $0x360] ss:$24 sps:$4 sm:$0xff]   ;;  %v4723_v12 = vld [vmem:[#allocation5 + $0x94] ss:$24 sps:$4 sm:$0xff]   ;;  %v4727_v14 = vld [vmem:[#allocation5 + $0x90] ss:$24 sps:$4 sm:$0xff]  }
  0x84   :  { %v4725_v13 = vld [vmem:[#allocation5 + $0x394] ss:$24 sps:$4 sm:$0xff]   ;;  %v4728_v15 = vld [vmem:[#allocation5 + $0x390] ss:$24 sps:$4 sm:$0xff]   ;;  %v4729_v16 = vld [vmem:[#allocation5 + $0xc4] ss:$24 sps:$4 sm:$0xff]  }
  0x85   :  { %1902 = vmatpush1.bf16.msra.mxu1 %v4715_v6  ;;  %v4731_v17 = vld [vmem:[#allocation5 + $0x3c4] ss:$24 sps:$4 sm:$0xff]   ;;  %v4733_v18 = vld [vmem:[#allocation5 + $0xc0] ss:$24 sps:$4 sm:$0xff]   ;;  %v4735_v20 = vld [vmem:[#allocation5 + $0xf4] ss:$24 sps:$4 sm:$0xff]  }
  0x86   :  { %1943 = vmatpush1.bf16.msra.mxu0 %v4716_v7  ;;  %1903 = vmatprep.subr.bf16.mxu1 %v4717_v8  ;;  %v4734_v19 = vld [vmem:[#allocation5 + $0x3c0] ss:$24 sps:$4 sm:$0xff]   ;;  %v4737_v21 = vld [vmem:[#allocation5 + $0x3f4] ss:$24 sps:$4 sm:$0xff]   ;;  %v4739_v22 = vld [vmem:[#allocation5 + $0xf0] ss:$24 sps:$4 sm:$0xff]  }
  0x87   :  { %1944 = vmatprep.subr.bf16.mxu0 %v4719_v9  ;;  %v4740_v23 = vld [vmem:[#allocation5 + $0x3f0] ss:$24 sps:$4 sm:$0xff]   ;;  %v4741_v24 = vld [vmem:[#allocation5 + $0x124] ss:$24 sps:$4 sm:$0xff]   ;;  %v4745_v26 = vld [vmem:[#allocation5 + $0x120] ss:$24 sps:$4 sm:$0xff]  }
  0x88   :  { %v4743_v25 = vld [vmem:[#allocation5 + $0x424] ss:$24 sps:$4 sm:$0xff]   ;;  %v4746_v27 = vld [vmem:[#allocation5 + $0x420] ss:$24 sps:$4 sm:$0xff]   ;;  %v4747_v28 = vld [vmem:[#allocation5 + $0x154] ss:$24 sps:$4 sm:$0xff]  }
  0x89   :  { %1904 = vmatpush1.bf16.msra.mxu1 %v4721_v10  ;;  %v4749_v29 = vld [vmem:[#allocation5 + $0x454] ss:$24 sps:$4 sm:$0xff]   ;;  %v4751_v30 = vld [vmem:[#allocation5 + $0x150] ss:$24 sps:$4 sm:$0xff]   ;;  %v4753_v32 = vld [vmem:[#allocation5 + $0x184] ss:$24 sps:$4 sm:$0xff]  }
  0x8a   :  { %1945 = vmatpush1.bf16.msra.mxu0 %v4722_v11  ;;  %1905 = vmatprep.subr.bf16.mxu1 %v4723_v12  ;;  %v4752_v31 = vld [vmem:[#allocation5 + $0x450] ss:$24 sps:$4 sm:$0xff]   ;;  %v4755_v33 = vld [vmem:[#allocation5 + $0x484] ss:$24 sps:$4 sm:$0xff]   ;;  %v4757_v34 = vld [vmem:[#allocation5 + $0x180] ss:$24 sps:$4 sm:$0xff]  }
  0x8b   :  { %1946 = vmatprep.subr.bf16.mxu0 %v4725_v13  ;;  %v4758_v35 = vld [vmem:[#allocation5 + $0x480] ss:$24 sps:$4 sm:$0xff]   ;;  %v4759_v36 = vld [vmem:[#allocation5 + $0x1b4] ss:$24 sps:$4 sm:$0xff]   ;;  %v4763_v38 = vld [vmem:[#allocation5 + $0x1b0] ss:$24 sps:$4 sm:$0xff]  }
  0x8c   :  { %v4761_v37 = vld [vmem:[#allocation5 + $0x4b4] ss:$24 sps:$4 sm:$0xff]   ;;  %v4764_v39 = vld [vmem:[#allocation5 + $0x4b0] ss:$24 sps:$4 sm:$0xff]   ;;  %v4765_v40 = vld [vmem:[#allocation5 + $0x1e4] ss:$24 sps:$4 sm:$0xff]  }
  0x8d   :  { %1906 = vmatpush1.bf16.msra.mxu1 %v4727_v14  ;;  %v4767_v41 = vld [vmem:[#allocation5 + $0x4e4] ss:$24 sps:$4 sm:$0xff]   ;;  %v4769_v42 = vld [vmem:[#allocation5 + $0x1e0] ss:$24 sps:$4 sm:$0xff]   ;;  %v4771_v44 = vld [vmem:[#allocation5 + $0x214] ss:$24 sps:$4 sm:$0xff]  }
  0x8e   :  { %1947 = vmatpush1.bf16.msra.mxu0 %v4728_v15  ;;  %1907 = vmatprep.subr.bf16.mxu1 %v4729_v16  ;;  %v4770_v43 = vld [vmem:[#allocation5 + $0x4e0] ss:$24 sps:$4 sm:$0xff]   ;;  %v4773_v45 = vld [vmem:[#allocation5 + $0x514] ss:$24 sps:$4 sm:$0xff]   ;;  %v4775_v49 = vld [vmem:[#allocation5 + $0x210] ss:$24 sps:$4 sm:$0xff]  }
  0x8f   :  { %1948 = vmatprep.subr.bf16.mxu0 %v4731_v17  ;;  %v115_v46 = vld [vmem:[#allocation2] sm:$0xff]  ;;  %v116_v48 = vld [vmem:[#allocation2 + $0x8] sm:$0xff]  ;;  %v4777_v52 = vld [vmem:[#allocation5 + $0x244] ss:$24 sps:$4 sm:$0xff]   ;;  %s5678_s6 = smov [#allocation14]  }
  0x90   :  { %v5803_v47 = vcombine.high %v115_v46, %v115_v46  ;;  %v4776_v50 = vld [vmem:[#allocation5 + $0x510] ss:$24 sps:$4 sm:$0xff]   ;;  %v5805_v51 = vcombine.high %v116_v48, %v116_v48  ;;  %v4779_v53 = vld [vmem:[#allocation5 + $0x544] ss:$24 sps:$4 sm:$0xff]   ;;  %v4781_v54 = vld [vmem:[#allocation5 + $0x240] ss:$24 sps:$4 sm:$0xff]   ;;  %v5809_v6 = vcombine.low %v115_v46, %v115_v46  ;;  %v5811_v7 = vcombine.low %v116_v48, %v116_v48 }
  0x91   :  { %1908 = vmatpush1.bf16.msra.mxu1 %v4733_v18  ;;  %v4782_v55 = vld [vmem:[#allocation5 + $0x540] ss:$24 sps:$4 sm:$0xff]   ;;  %v4783_v56 = vld [vmem:[#allocation5 + $0x274] ss:$24 sps:$4 sm:$0xff]   ;;  %v4787_v58 = vld [vmem:[#allocation5 + $0x270] ss:$24 sps:$4 sm:$0xff]  }
  0x92   :  { %1949 = vmatpush1.bf16.msra.mxu0 %v4734_v19  ;;  %1909 = vmatprep.subr.bf16.mxu1 %v4735_v20  ;;  %v4785_v57 = vld [vmem:[#allocation5 + $0x574] ss:$24 sps:$4 sm:$0xff]   ;;  %v4788_v59 = vld [vmem:[#allocation5 + $0x570] ss:$24 sps:$4 sm:$0xff]   ;;  %v4789_v60 = vld [vmem:[#allocation5 + $0x2a4] ss:$24 sps:$4 sm:$0xff]  }
  0x93   :  { %1950 = vmatprep.subr.bf16.mxu0 %v4737_v21  ;;  %1931 = vmatprep.mubr.bf16.mxu1 %v5803_v47  ;;  %v4791_v61 = vld [vmem:[#allocation5 + $0x5a4] ss:$24 sps:$4 sm:$0xff]   ;;  %v4793_v62 = vld [vmem:[#allocation5 + $0x2a0] ss:$24 sps:$4 sm:$0xff]   ;;  %v4795_v0 = vld [vmem:[#allocation5 + $0x2d4] ss:$24 sps:$4 sm:$0xff]  }
  0x94   :  { %1972 = vmatprep.mubr.bf16.mxu0 %v5805_v51  ;;  %v4794_v63 = vld [vmem:[#allocation5 + $0x5a0] ss:$24 sps:$4 sm:$0xff]   ;;  %v4797_v1 = vld [vmem:[#allocation5 + $0x5d4] ss:$24 sps:$4 sm:$0xff]   ;;  %v4799_v2 = vld [vmem:[#allocation5 + $0x2d0] ss:$24 sps:$4 sm:$0xff]  }
  0x95   :  { %1910 = vmatpush1.bf16.msra.mxu1 %v4739_v22  ;;  %v4800_v3 = vld [vmem:[#allocation5 + $0x5d0] ss:$24 sps:$4 sm:$0xff]   ;;  %v4806_v4 = vld [vmem:[#allocation5 + $0x604] ss:$24 sps:$4 sm:$0xff]   ;;  %v4804_v8 = vld [vmem:[#allocation5 + $0x600] ss:$24 sps:$4 sm:$0xff]  }
  0x96   :  { %1951 = vmatpush1.bf16.msra.mxu0 %v4740_v23  ;;  %1911 = vmatprep.subr.bf16.mxu1 %v4741_v24  ;;  %v4809_v5 = vld [vmem:[#allocation5 + $0xc] ss:$24 sps:$4 sm:$0xff]   ;;  %v4807_v9 = vld [vmem:[#allocation5 + $0x8] ss:$24 sps:$4 sm:$0xff]   ;;  %v4816_v11 = vld [vmem:[#allocation5 + $0x3c] ss:$24 sps:$4 sm:$0xff]  }
  0x97   :  { %1952 = vmatprep.subr.bf16.mxu0 %v4743_v25  ;;  %v4813_v10 = vld [vmem:[#allocation5 + $0x634] ss:$24 sps:$4 sm:$0xff]   ;;  %v4811_v12 = vld [vmem:[#allocation5 + $0x630] ss:$24 sps:$4 sm:$0xff]   ;;  %v4819_v14 = vld [vmem:[#allocation5 + $0x664] ss:$24 sps:$4 sm:$0xff]  }
  0x98   :  { %v4814_v13 = vld [vmem:[#allocation5 + $0x38] ss:$24 sps:$4 sm:$0xff]   ;;  %v4822_v15 = vld [vmem:[#allocation5 + $0x6c] ss:$24 sps:$4 sm:$0xff]   ;;  %v4820_v17 = vld [vmem:[#allocation5 + $0x68] ss:$24 sps:$4 sm:$0xff]  }
  0x99   :  { %1912 = vmatpush1.bf16.msra.mxu1 %v4745_v26  ;;  %v4817_v16 = vld [vmem:[#allocation5 + $0x660] ss:$24 sps:$4 sm:$0xff]   ;;  %v4825_v18 = vld [vmem:[#allocation5 + $0x694] ss:$24 sps:$4 sm:$0xff]   ;;  %v4823_v20 = vld [vmem:[#allocation5 + $0x690] ss:$24 sps:$4 sm:$0xff]  }
  0x9a   :  { %1953 = vmatpush1.bf16.msra.mxu0 %v4746_v27  ;;  %1913 = vmatprep.subr.bf16.mxu1 %v4747_v28  ;;  %v4828_v19 = vld [vmem:[#allocation5 + $0x9c] ss:$24 sps:$4 sm:$0xff]   ;;  %v4826_v21 = vld [vmem:[#allocation5 + $0x98] ss:$24 sps:$4 sm:$0xff]   ;;  %v4834_v23 = vld [vmem:[#allocation5 + $0xcc] ss:$24 sps:$4 sm:$0xff]  }
  0x9b   :  { %1954 = vmatprep.subr.bf16.mxu0 %v4749_v29  ;;  %v4831_v22 = vld [vmem:[#allocation5 + $0x6c4] ss:$24 sps:$4 sm:$0xff]   ;;  %v4829_v24 = vld [vmem:[#allocation5 + $0x6c0] ss:$24 sps:$4 sm:$0xff]   ;;  %v4837_v26 = vld [vmem:[#allocation5 + $0x6f4] ss:$24 sps:$4 sm:$0xff]  }
  0x9c   :  { %v4832_v25 = vld [vmem:[#allocation5 + $0xc8] ss:$24 sps:$4 sm:$0xff]   ;;  %v4840_v27 = vld [vmem:[#allocation5 + $0xfc] ss:$24 sps:$4 sm:$0xff]   ;;  %v4838_v29 = vld [vmem:[#allocation5 + $0xf8] ss:$24 sps:$4 sm:$0xff]  }
  0x9d   :  { %1914 = vmatpush1.bf16.msra.mxu1 %v4751_v30  ;;  %v4835_v28 = vld [vmem:[#allocation5 + $0x6f0] ss:$24 sps:$4 sm:$0xff]   ;;  %v4843_v30 = vld [vmem:[#allocation5 + $0x724] ss:$24 sps:$4 sm:$0xff]   ;;  %s4068_s13 = sshll.u32 %s5678_s6, 4  ;;  %s4069_s13 = int_to_ptr.vmem [resolvable:$true] %s4068_s13 }
  0x9e   :  { %1955 = vmatpush1.bf16.msra.mxu0 %v4752_v31  ;;  %1915 = vmatprep.subr.bf16.mxu1 %v4753_v32  ;;  %v4846_v31 = vld [vmem:[#allocation5 + $0x12c] ss:$24 sps:$4 sm:$0xff]   ;;  %v5816_v32 = vld [vmem:[#allocation2 + $0x10] sm:$0xff]  ;;  %v4859_v46 = vld [vmem:[#allocation5 + $0x7b0] ss:$24 sps:$4 sm:$0xff]   ;;  %s5633_s14 = scalar_lea.vmem %s4069_s13, 128  ;;  %p5638_p1 = scmp.lt.s32.totalorder %s4069_s13, %s4069_s13 }
  0x9f   :  { %1956 = vmatprep.subr.bf16.mxu0 %v4755_v33  ;;  %v4841_v33 = vld [vmem:[#allocation5 + $0x720] ss:$24 sps:$4 sm:$0xff]   ;;  %p5634_p0 = scmp.ne.s32.totalorder %s4069_s13, %s5633_s14  ;;  %p5639_p2 = scmp.lt.s32.totalorder %s5633_s14, %s5633_s14 }
  0xa0   :  { %v4862_v48 = vld [vmem:[#allocation5 + $0x1b8] ss:$24 sps:$4 sm:$0xff]  }
  0xa1   :  { %1916 = vmatpush1.bf16.msra.mxu1 %v4757_v34  ;;  %v5820_v34 = vcombine.high %v5816_v32, %v5816_v32  ;;  %p5640_p3 = por %p5639_p2, %p5638_p1 }
  0xa2   :  { %1957 = vmatpush1.bf16.msra.mxu0 %v4758_v35  ;;  %1917 = vmatprep.subr.bf16.mxu1 %v4759_v36  ;;  %v4844_v35 = vld [vmem:[#allocation5 + $0x128] ss:$24 sps:$4 sm:$0xff]   ;;  %v4849_v36 = vld [vmem:[#allocation5 + $0x754] ss:$24 sps:$4 sm:$0xff]  }
  0xa3   :  { %1958 = vmatprep.subr.bf16.mxu0 %v4761_v37  ;;  %v4852_v37 = vld [vmem:[#allocation5 + $0x15c] ss:$24 sps:$4 sm:$0xff]   ;;  %p5641_p4 = pnand %p5640_p3, %p5634_p0 }
  0xa5   :  { %1918 = vmatpush1.bf16.msra.mxu1 %v4763_v38  ;;  %v4847_v38 = vld [vmem:[#allocation5 + $0x750] ss:$24 sps:$4 sm:$0xff]  }
  0xa6   :  { %1959 = vmatpush1.bf16.msra.mxu0 %v4764_v39  ;;  %1919 = vmatprep.subr.bf16.mxu1 %v4765_v40  ;;  %v4850_v39 = vld [vmem:[#allocation5 + $0x158] ss:$24 sps:$4 sm:$0xff]   ;;  %v4855_v40 = vld [vmem:[#allocation5 + $0x784] ss:$24 sps:$4 sm:$0xff]  }
  0xa7   :  { %1960 = vmatprep.subr.bf16.mxu0 %v4767_v41  ;;  %v4858_v41 = vld [vmem:[#allocation5 + $0x18c] ss:$24 sps:$4 sm:$0xff]  }
  0xa9   :  { %1920 = vmatpush1.bf16.msra.mxu1 %v4769_v42  ;;  %v4853_v42 = vld [vmem:[#allocation5 + $0x780] ss:$24 sps:$4 sm:$0xff]  }
  0xaa   :  { %1961 = vmatpush1.bf16.msra.mxu0 %v4770_v43  ;;  %1921 = vmatprep.subr.bf16.mxu1 %v4771_v44  ;;  %v4856_v43 = vld [vmem:[#allocation5 + $0x188] ss:$24 sps:$4 sm:$0xff]   ;;  %v4861_v44 = vld [vmem:[#allocation5 + $0x7b4] ss:$24 sps:$4 sm:$0xff]  }
  0xab   :  { %1962 = vmatprep.subr.bf16.mxu0 %v4773_v45  ;;  %v4864_v45 = vld [vmem:[#allocation5 + $0x1bc] ss:$24 sps:$4 sm:$0xff]  }
  0xad   :  { %1922 = vmatpush1.bf16.msra.mxu1 %v4775_v49  ;;  %v4867_v49 = vld [vmem:[#allocation5 + $0x7e4] ss:$24 sps:$4 sm:$0xff]  }
  0xae   :  { %1963 = vmatpush1.bf16.msra.mxu0 %v4776_v50  ;;  %1923 = vmatprep.subr.bf16.mxu1 %v4777_v52  ;;  %v4870_v50 = vld [vmem:[#allocation5 + $0x1ec] ss:$24 sps:$4 sm:$0xff]   ;;  %v4865_v52 = vld [vmem:[#allocation5 + $0x7e0] ss:$24 sps:$4 sm:$0xff]  }
  0xaf   :  { %1964 = vmatprep.subr.bf16.mxu0 %v4779_v53  ;;  %v4868_v53 = vld [vmem:[#allocation5 + $0x1e8] ss:$24 sps:$4 sm:$0xff]  }
  0xb1   :  { %1924 = vmatpush1.bf16.msra.mxu1 %v4781_v54  ;;  %v4873_v54 = vld [vmem:[#allocation5 + $0x814] ss:$24 sps:$4 sm:$0xff]  }
  0xb2   :  { %1965 = vmatpush1.bf16.msra.mxu0 %v4782_v55  ;;  %1925 = vmatprep.subr.bf16.mxu1 %v4783_v56  ;;  %v4876_v55 = vld [vmem:[#allocation5 + $0x21c] ss:$24 sps:$4 sm:$0xff]   ;;  %v4871_v56 = vld [vmem:[#allocation5 + $0x810] ss:$24 sps:$4 sm:$0xff]  }
  0xb3   :  { %1966 = vmatprep.subr.bf16.mxu0 %v4785_v57  ;;  %v4874_v57 = vld [vmem:[#allocation5 + $0x218] ss:$24 sps:$4 sm:$0xff]  }
  0xb5   :  { %1926 = vmatpush1.bf16.msra.mxu1 %v4787_v58  ;;  %v4879_v58 = vld [vmem:[#allocation5 + $0x844] ss:$24 sps:$4 sm:$0xff]  }
  0xb6   :  { %1967 = vmatpush1.bf16.msra.mxu0 %v4788_v59  ;;  %1927 = vmatprep.subr.bf16.mxu1 %v4789_v60  ;;  %v4882_v59 = vld [vmem:[#allocation5 + $0x24c] ss:$24 sps:$4 sm:$0xff]   ;;  %v4877_v60 = vld [vmem:[#allocation5 + $0x840] ss:$24 sps:$4 sm:$0xff]  }
  0xb7   :  { %1968 = vmatprep.subr.bf16.mxu0 %v4791_v61  ;;  %v4880_v61 = vld [vmem:[#allocation5 + $0x248] ss:$24 sps:$4 sm:$0xff]  }
  0xb9   :  { %1928 = vmatpush1.bf16.msra.mxu1 %v4793_v62  ;;  %v4885_v62 = vld [vmem:[#allocation5 + $0x874] ss:$24 sps:$4 sm:$0xff]  }
  0xba   :  { %1969 = vmatpush1.bf16.msra.mxu0 %v4794_v63  ;;  %1929 = vmatprep.subr.bf16.mxu1 %v4795_v0  ;;  %v4888_v63 = vld [vmem:[#allocation5 + $0x27c] ss:$24 sps:$4 sm:$0xff]   ;;  %v4883_v0 = vld [vmem:[#allocation5 + $0x870] ss:$24 sps:$4 sm:$0xff]  }
  0xbb   :  { %1970 = vmatprep.subr.bf16.mxu0 %v4797_v1  ;;  %v4886_v1 = vld [vmem:[#allocation5 + $0x278] ss:$24 sps:$4 sm:$0xff]  }
  0xbd   :  { %1930 = vmatpush1.bf16.msra.mxu1 %v4799_v2  ;;  %v4891_v2 = vld [vmem:[#allocation5 + $0x8a4] ss:$24 sps:$4 sm:$0xff]  }
  0xbe   :  { %1971 = vmatpush1.bf16.msra.mxu0 %v4800_v3  ;;  %2022 = vmatprep.subr.bf16.mxu1 %v4809_v5  ;;  %v4894_v3 = vld [vmem:[#allocation5 + $0x2ac] ss:$24 sps:$4 sm:$0xff]   ;;  %v4892_v5 = vld [vmem:[#allocation5 + $0x2a8] ss:$24 sps:$4 sm:$0xff]  }
  0xbf   :  { %1981 = vmatprep.subr.bf16.mxu0 %v4806_v4  ;;  %v4889_v4 = vld [vmem:[#allocation5 + $0x8a0] ss:$24 sps:$4 sm:$0xff]  }
  0xc0   :  { %1932 = vmatmul.mubr.bf16.vlgmr.msra.gmra.mrb[0].mxu1 %v5809_v6 }
  0xc1   :  { %1973 = vmatmul.mubr.bf16.vlgmr.msra.gmra.mrb[0].mxu0 %v5811_v7  ;;  %2023 = vmatpush1.bf16.msra.mxu1 %v4807_v9  ;;  %v4900_v9 = vld [vmem:[#allocation5 + $0x2dc] ss:$24 sps:$4 sm:$0xff]  }
  0xc2   :  { %1982 = vmatpush1.bf16.msra.mxu0 %v4804_v8  ;;  %2024 = vmatprep.subr.bf16.mxu1 %v4816_v11  ;;  %v4897_v8 = vld [vmem:[#allocation5 + $0x8d4] ss:$24 sps:$4 sm:$0xff]   ;;  %v4898_v11 = vld [vmem:[#allocation5 + $0x2d8] ss:$24 sps:$4 sm:$0xff]  }
  0xc3   :  { %1983 = vmatprep.subr.bf16.mxu0 %v4813_v10  ;;  %2054 = vmatprep.mubr.bf16.mxu1 %v5803_v47  ;;  %v4895_v10 = vld [vmem:[#allocation5 + $0x8d0] ss:$24 sps:$4 sm:$0xff]  }
  0xc4   :  { %2013 = vmatprep.mubr.bf16.mxu0 %v5820_v34 }
  0xc5   :  { %2025 = vmatpush1.bf16.msra.mxu1 %v4814_v13  ;;  %v4908_v13 = vld [vmem:[#allocation5 + $0x14] ss:$24 sps:$4 sm:$0xff]  }
  0xc6   :  { %1984 = vmatpush1.bf16.msra.mxu0 %v4811_v12  ;;  %2026 = vmatprep.subr.bf16.mxu1 %v4822_v15  ;;  %v4905_v12 = vld [vmem:[#allocation5 + $0x30c] ss:$24 sps:$4 sm:$0xff]   ;;  %v4903_v15 = vld [vmem:[#allocation5 + $0x308] ss:$24 sps:$4 sm:$0xff]  }
  0xc7   :  { %1985 = vmatprep.subr.bf16.mxu0 %v4819_v14  ;;  %v5825_v14 = vcombine.low %v5816_v32, %v5816_v32  ;;  %v4935_v32 = vld [vmem:[#allocation5 + $0x3fc] ss:$24 sps:$4 sm:$0xff]  }
  0xc9   :  { %2027 = vmatpush1.bf16.msra.mxu1 %v4820_v17  ;;  %v4911_v17 = vld [vmem:[#allocation5 + $0x33c] ss:$24 sps:$4 sm:$0xff]  }
  0xca   :  { %1986 = vmatpush1.bf16.msra.mxu0 %v4817_v16  ;;  %2028 = vmatprep.subr.bf16.mxu1 %v4828_v19  ;;  %v4906_v16 = vld [vmem:[#allocation5 + $0x10] ss:$24 sps:$4 sm:$0xff]  }
  0xcb   :  { %1987 = vmatprep.subr.bf16.mxu0 %v4825_v18  ;;  %v4914_v18 = vld [vmem:[#allocation5 + $0x44] ss:$24 sps:$4 sm:$0xff]   ;;  %v4909_v19 = vld [vmem:[#allocation5 + $0x338] ss:$24 sps:$4 sm:$0xff]  }
  0xcd   :  { %2029 = vmatpush1.bf16.msra.mxu1 %v4826_v21  ;;  %v4917_v21 = vld [vmem:[#allocation5 + $0x36c] ss:$24 sps:$4 sm:$0xff]  }
  0xce   :  { %1988 = vmatpush1.bf16.msra.mxu0 %v4823_v20  ;;  %2030 = vmatprep.subr.bf16.mxu1 %v4834_v23  ;;  %v4912_v20 = vld [vmem:[#allocation5 + $0x40] ss:$24 sps:$4 sm:$0xff]  }
  0xcf   :  { %1989 = vmatprep.subr.bf16.mxu0 %v4831_v22  ;;  %v4920_v22 = vld [vmem:[#allocation5 + $0x74] ss:$24 sps:$4 sm:$0xff]   ;;  %v4915_v23 = vld [vmem:[#allocation5 + $0x368] ss:$24 sps:$4 sm:$0xff]  }
  0xd1   :  { %2031 = vmatpush1.bf16.msra.mxu1 %v4832_v25  ;;  %v4923_v25 = vld [vmem:[#allocation5 + $0x39c] ss:$24 sps:$4 sm:$0xff]  }
  0xd2   :  { %1990 = vmatpush1.bf16.msra.mxu0 %v4829_v24  ;;  %2032 = vmatprep.subr.bf16.mxu1 %v4840_v27  ;;  %v4918_v24 = vld [vmem:[#allocation5 + $0x70] ss:$24 sps:$4 sm:$0xff]  }
  0xd3   :  { %1991 = vmatprep.subr.bf16.mxu0 %v4837_v26  ;;  %v4926_v26 = vld [vmem:[#allocation5 + $0xa4] ss:$24 sps:$4 sm:$0xff]   ;;  %v4921_v27 = vld [vmem:[#allocation5 + $0x398] ss:$24 sps:$4 sm:$0xff]  }
  0xd5   :  { %2033 = vmatpush1.bf16.msra.mxu1 %v4838_v29  ;;  %v4929_v29 = vld [vmem:[#allocation5 + $0x3cc] ss:$24 sps:$4 sm:$0xff]  }
  0xd6   :  { %1992 = vmatpush1.bf16.msra.mxu0 %v4835_v28  ;;  %2034 = vmatprep.subr.bf16.mxu1 %v4846_v31  ;;  %v4924_v28 = vld [vmem:[#allocation5 + $0xa0] ss:$24 sps:$4 sm:$0xff]  }
  0xd7   :  { %1993 = vmatprep.subr.bf16.mxu0 %v4843_v30  ;;  %v4932_v30 = vld [vmem:[#allocation5 + $0xd4] ss:$24 sps:$4 sm:$0xff]   ;;  %v4927_v31 = vld [vmem:[#allocation5 + $0x3c8] ss:$24 sps:$4 sm:$0xff]  }
  0xd9   :  { %2035 = vmatpush1.bf16.msra.mxu1 %v4844_v35  ;;  %v4933_v35 = vld [vmem:[#allocation5 + $0x3f8] ss:$24 sps:$4 sm:$0xff]  }
  0xda   :  { %1994 = vmatpush1.bf16.msra.mxu0 %v4841_v33  ;;  %2036 = vmatprep.subr.bf16.mxu1 %v4852_v37  ;;  %v4938_v33 = vld [vmem:[#allocation5 + $0x104] ss:$24 sps:$4 sm:$0xff]  }
  0xdb   :  { %1995 = vmatprep.subr.bf16.mxu0 %v4849_v36  ;;  %v4936_v36 = vld [vmem:[#allocation5 + $0x100] ss:$24 sps:$4 sm:$0xff]   ;;  %v4941_v37 = vld [vmem:[#allocation5 + $0x42c] ss:$24 sps:$4 sm:$0xff]  }
  0xdd   :  { %2037 = vmatpush1.bf16.msra.mxu1 %v4850_v39  ;;  %v4939_v39 = vld [vmem:[#allocation5 + $0x428] ss:$24 sps:$4 sm:$0xff]  }
  0xde   :  { %1996 = vmatpush1.bf16.msra.mxu0 %v4847_v38  ;;  %2038 = vmatprep.subr.bf16.mxu1 %v4858_v41  ;;  %v4944_v38 = vld [vmem:[#allocation5 + $0x134] ss:$24 sps:$4 sm:$0xff]  }
  0xdf   :  { %1997 = vmatprep.subr.bf16.mxu0 %v4855_v40  ;;  %v4942_v40 = vld [vmem:[#allocation5 + $0x130] ss:$24 sps:$4 sm:$0xff]   ;;  %v4947_v41 = vld [vmem:[#allocation5 + $0x45c] ss:$24 sps:$4 sm:$0xff]  }
  0xe1   :  { %2039 = vmatpush1.bf16.msra.mxu1 %v4856_v43  ;;  %v4945_v43 = vld [vmem:[#allocation5 + $0x458] ss:$24 sps:$4 sm:$0xff]  }
  0xe2   :  { %1998 = vmatpush1.bf16.msra.mxu0 %v4853_v42  ;;  %2040 = vmatprep.subr.bf16.mxu1 %v4864_v45  ;;  %v4950_v42 = vld [vmem:[#allocation5 + $0x164] ss:$24 sps:$4 sm:$0xff]  }
  0xe3   :  { %1999 = vmatprep.subr.bf16.mxu0 %v4861_v44  ;;  %v4948_v44 = vld [vmem:[#allocation5 + $0x160] ss:$24 sps:$4 sm:$0xff]   ;;  %v4953_v45 = vld [vmem:[#allocation5 + $0x48c] ss:$24 sps:$4 sm:$0xff]  }
  0xe5   :  { %2041 = vmatpush1.bf16.msra.mxu1 %v4862_v48  ;;  %v4951_v48 = vld [vmem:[#allocation5 + $0x488] ss:$24 sps:$4 sm:$0xff]  }
  0xe6   :  { %2000 = vmatpush1.bf16.msra.mxu0 %v4859_v46  ;;  %2042 = vmatprep.subr.bf16.mxu1 %v4870_v50  ;;  %v4956_v46 = vld [vmem:[#allocation5 + $0x194] ss:$24 sps:$4 sm:$0xff]  }
  0xe7   :  { %2001 = vmatprep.subr.bf16.mxu0 %v4867_v49  ;;  %v4954_v49 = vld [vmem:[#allocation5 + $0x190] ss:$24 sps:$4 sm:$0xff]   ;;  %v4959_v50 = vld [vmem:[#allocation5 + $0x4bc] ss:$24 sps:$4 sm:$0xff]  }
  0xe9   :  { %2043 = vmatpush1.bf16.msra.mxu1 %v4868_v53  ;;  %v4957_v53 = vld [vmem:[#allocation5 + $0x4b8] ss:$24 sps:$4 sm:$0xff]  }
  0xea   :  { %2002 = vmatpush1.bf16.msra.mxu0 %v4865_v52  ;;  %2044 = vmatprep.subr.bf16.mxu1 %v4876_v55  ;;  %v4962_v52 = vld [vmem:[#allocation5 + $0x1c4] ss:$24 sps:$4 sm:$0xff]  }
  0xeb   :  { %2003 = vmatprep.subr.bf16.mxu0 %v4873_v54  ;;  %v4960_v54 = vld [vmem:[#allocation5 + $0x1c0] ss:$24 sps:$4 sm:$0xff]   ;;  %v4965_v55 = vld [vmem:[#allocation5 + $0x4ec] ss:$24 sps:$4 sm:$0xff]  }
  0xed   :  { %2045 = vmatpush1.bf16.msra.mxu1 %v4874_v57  ;;  %v4963_v57 = vld [vmem:[#allocation5 + $0x4e8] ss:$24 sps:$4 sm:$0xff]  }
  0xee   :  { %2004 = vmatpush1.bf16.msra.mxu0 %v4871_v56  ;;  %2046 = vmatprep.subr.bf16.mxu1 %v4882_v59  ;;  %v4968_v56 = vld [vmem:[#allocation5 + $0x1f4] ss:$24 sps:$4 sm:$0xff]  }
  0xef   :  { %2005 = vmatprep.subr.bf16.mxu0 %v4879_v58  ;;  %v4966_v58 = vld [vmem:[#allocation5 + $0x1f0] ss:$24 sps:$4 sm:$0xff]   ;;  %v4971_v59 = vld [vmem:[#allocation5 + $0x51c] ss:$24 sps:$4 sm:$0xff]  }
  0xf1   :  { %2047 = vmatpush1.bf16.msra.mxu1 %v4880_v61  ;;  %v4969_v61 = vld [vmem:[#allocation5 + $0x518] ss:$24 sps:$4 sm:$0xff]  }
  0xf2   :  { %2006 = vmatpush1.bf16.msra.mxu0 %v4877_v60  ;;  %2048 = vmatprep.subr.bf16.mxu1 %v4888_v63  ;;  %v4974_v60 = vld [vmem:[#allocation5 + $0x224] ss:$24 sps:$4 sm:$0xff]  }
  0xf3   :  { %2007 = vmatprep.subr.bf16.mxu0 %v4885_v62  ;;  %v4972_v62 = vld [vmem:[#allocation5 + $0x220] ss:$24 sps:$4 sm:$0xff]   ;;  %v4977_v63 = vld [vmem:[#allocation5 + $0x54c] ss:$24 sps:$4 sm:$0xff]  }
  0xf5   :  { %2049 = vmatpush1.bf16.msra.mxu1 %v4886_v1  ;;  %v4975_v1 = vld [vmem:[#allocation5 + $0x548] ss:$24 sps:$4 sm:$0xff]  }
  0xf6   :  { %2008 = vmatpush1.bf16.msra.mxu0 %v4883_v0  ;;  %2050 = vmatprep.subr.bf16.mxu1 %v4894_v3  ;;  %v4980_v0 = vld [vmem:[#allocation5 + $0x254] ss:$24 sps:$4 sm:$0xff]  }
  0xf7   :  { %2009 = vmatprep.subr.bf16.mxu0 %v4891_v2  ;;  %v4978_v2 = vld [vmem:[#allocation5 + $0x250] ss:$24 sps:$4 sm:$0xff]   ;;  %v4983_v3 = vld [vmem:[#allocation5 + $0x57c] ss:$24 sps:$4 sm:$0xff]  }
  0xf9   :  { %2051 = vmatpush1.bf16.msra.mxu1 %v4892_v5  ;;  %v4981_v5 = vld [vmem:[#allocation5 + $0x578] ss:$24 sps:$4 sm:$0xff]  }
  0xfa   :  { %2010 = vmatpush1.bf16.msra.mxu0 %v4889_v4  ;;  %2052 = vmatprep.subr.bf16.mxu1 %v4900_v9  ;;  %v4986_v4 = vld [vmem:[#allocation5 + $0x284] ss:$24 sps:$4 sm:$0xff]  }
  0xfb   :  { %2011 = vmatprep.subr.bf16.mxu0 %v4897_v8  ;;  %v4984_v8 = vld [vmem:[#allocation5 + $0x280] ss:$24 sps:$4 sm:$0xff]   ;;  %v4989_v9 = vld [vmem:[#allocation5 + $0x5ac] ss:$24 sps:$4 sm:$0xff]  }
  0xfd   :  { %2053 = vmatpush1.bf16.msra.mxu1 %v4898_v11  ;;  %v4987_v11 = vld [vmem:[#allocation5 + $0x5a8] ss:$24 sps:$4 sm:$0xff]  }
  0xfe   :  { %2012 = vmatpush1.bf16.msra.mxu0 %v4895_v10  ;;  %2063 = vmatprep.subr.bf16.mxu1 %v4905_v12  ;;  %v4992_v10 = vld [vmem:[#allocation5 + $0x2b4] ss:$24 sps:$4 sm:$0xff]   ;;  %v4990_v12 = vld [vmem:[#allocation5 + $0x2b0] ss:$24 sps:$4 sm:$0xff]  }
  0xff   :  { %2145 = vmatprep.subr.bf16.mxu0 %v4908_v13  ;;  %v4995_v13 = vld [vmem:[#allocation5 + $0x5dc] ss:$24 sps:$4 sm:$0xff]  }
 0x100   :  { %2055 = vmatmul.mubr.bf16.vlgmr.msra.gmra.mrb[4].mxu1 %v5809_v6 }
 0x101   :  { %2014 = vmatmul.mubr.bf16.vlgmr.msra.gmra.mrb[0].mxu0 %v5825_v14  ;;  %2064 = vmatpush1.bf16.msra.mxu1 %v4903_v15  ;;  %v4998_v15 = vld [vmem:[#allocation5 + $0x2e4] ss:$24 sps:$4 sm:$0xff]  }
 0x102   :  { %2146 = vmatpush1.bf16.msra.mxu0 %v4906_v16  ;;  %2065 = vmatprep.subr.bf16.mxu1 %v4911_v17  ;;  %v4993_v16 = vld [vmem:[#allocation5 + $0x5d8] ss:$24 sps:$4 sm:$0xff]  }
 0x103   :  { %2147 = vmatprep.subr.bf16.mxu0 %v4914_v18  ;;  %2095 = vmatprep.mubr.bf16.mxu1 %v5805_v51  ;;  %v4996_v17 = vld [vmem:[#allocation5 + $0x2e0] ss:$24 sps:$4 sm:$0xff]   ;;  %v5001_v18 = vld [vmem:[#allocation5 + $0x60c] ss:$24 sps:$4 sm:$0xff]  }
 0x104   :  { %2177 = vmatprep.mubr.bf16.mxu0 %v5803_v47  ;;  %v4930_v47 = vld [vmem:[#allocation5 + $0xd0] ss:$24 sps:$4 sm:$0xff]  }
 0x105   :  { %2066 = vmatpush1.bf16.msra.mxu1 %v4909_v19  ;;  %v5004_v19 = vld [vmem:[#allocation5 + $0x314] ss:$24 sps:$4 sm:$0xff]  }
 0x106   :  { %2148 = vmatpush1.bf16.msra.mxu0 %v4912_v20  ;;  %2067 = vmatprep.subr.bf16.mxu1 %v4917_v21  ;;  %v4999_v20 = vld [vmem:[#allocation5 + $0x608] ss:$24 sps:$4 sm:$0xff]  }
 0x107   :  { %2149 = vmatprep.subr.bf16.mxu0 %v4920_v22  ;;  %v5002_v21 = vld [vmem:[#allocation5 + $0x310] ss:$24 sps:$4 sm:$0xff]   ;;  %v5007_v22 = vld [vmem:[#allocation5 + $0x63c] ss:$24 sps:$4 sm:$0xff]  }
 0x109   :  { %2068 = vmatpush1.bf16.msra.mxu1 %v4915_v23  ;;  %v5010_v23 = vld [vmem:[#allocation5 + $0x344] ss:$24 sps:$4 sm:$0xff]  }
 0x10a   :  { %2150 = vmatpush1.bf16.msra.mxu0 %v4918_v24  ;;  %2069 = vmatprep.subr.bf16.mxu1 %v4923_v25  ;;  %v5005_v24 = vld [vmem:[#allocation5 + $0x638] ss:$24 sps:$4 sm:$0xff]  }
 0x10b   :  { %2151 = vmatprep.subr.bf16.mxu0 %v4926_v26  ;;  %v5008_v25 = vld [vmem:[#allocation5 + $0x340] ss:$24 sps:$4 sm:$0xff]   ;;  %v5013_v26 = vld [vmem:[#allocation5 + $0x66c] ss:$24 sps:$4 sm:$0xff]  }
 0x10d   :  { %2070 = vmatpush1.bf16.msra.mxu1 %v4921_v27  ;;  %v5016_v27 = vld [vmem:[#allocation5 + $0x374] ss:$24 sps:$4 sm:$0xff]  }
 0x10e   :  { %2152 = vmatpush1.bf16.msra.mxu0 %v4924_v28  ;;  %2071 = vmatprep.subr.bf16.mxu1 %v4929_v29  ;;  %v5011_v28 = vld [vmem:[#allocation5 + $0x668] ss:$24 sps:$4 sm:$0xff]  }
 0x10f   :  { %2153 = vmatprep.subr.bf16.mxu0 %v4932_v30  ;;  %v5014_v29 = vld [vmem:[#allocation5 + $0x370] ss:$24 sps:$4 sm:$0xff]   ;;  %v5019_v30 = vld [vmem:[#allocation5 + $0x69c] ss:$24 sps:$4 sm:$0xff]  }
 0x111   :  { %2072 = vmatpush1.bf16.msra.mxu1 %v4927_v31  ;;  %v5017_v31 = vld [vmem:[#allocation5 + $0x698] ss:$24 sps:$4 sm:$0xff]  }
 0x112   :  { %2154 = vmatpush1.bf16.msra.mxu0 %v4930_v47  ;;  %2073 = vmatprep.subr.bf16.mxu1 %v4935_v32  ;;  %v5020_v47 = vld [vmem:[#allocation5 + $0x3a0] ss:$24 sps:$4 sm:$0xff]   ;;  %v5025_v32 = vld [vmem:[#allocation5 + $0x6cc] ss:$24 sps:$4 sm:$0xff]  }
 0x113   :  { %2155 = vmatprep.subr.bf16.mxu0 %v4938_v33  ;;  %v5028_v33 = vld [vmem:[#allocation5 + $0x3d4] ss:$24 sps:$4 sm:$0xff]  }
 0x115   :  { %2074 = vmatpush1.bf16.msra.mxu1 %v4933_v35  ;;  %v5023_v35 = vld [vmem:[#allocation5 + $0x6c8] ss:$24 sps:$4 sm:$0xff]  }
 0x116   :  { %2156 = vmatpush1.bf16.msra.mxu0 %v4936_v36  ;;  %2075 = vmatprep.subr.bf16.mxu1 %v4941_v37  ;;  %v5026_v36 = vld [vmem:[#allocation5 + $0x3d0] ss:$24 sps:$4 sm:$0xff]   ;;  %v5034_v37 = vld [vmem:[#allocation5 + $0x404] ss:$24 sps:$4 sm:$0xff]  }
 0x117   :  { %2157 = vmatprep.subr.bf16.mxu0 %v4944_v38  ;;  %v5029_v38 = vld [vmem:[#allocation5 + $0x6f8] ss:$24 sps:$4 sm:$0xff]  }
 0x119   :  { %2076 = vmatpush1.bf16.msra.mxu1 %v4939_v39  ;;  %v5032_v39 = vld [vmem:[#allocation5 + $0x400] ss:$24 sps:$4 sm:$0xff]  }
 0x11a   :  { %2158 = vmatpush1.bf16.msra.mxu0 %v4942_v40  ;;  %2077 = vmatprep.subr.bf16.mxu1 %v4947_v41  ;;  %v5037_v40 = vld [vmem:[#allocation5 + $0x72c] ss:$24 sps:$4 sm:$0xff]  }
 0x11b   :  { %2159 = vmatprep.subr.bf16.mxu0 %v4950_v42  ;;  %v5040_v41 = vld [vmem:[#allocation5 + $0x434] ss:$24 sps:$4 sm:$0xff]   ;;  %v5035_v42 = vld [vmem:[#allocation5 + $0x728] ss:$24 sps:$4 sm:$0xff]  }
 0x11d   :  { %2078 = vmatpush1.bf16.msra.mxu1 %v4945_v43  ;;  %v5038_v43 = vld [vmem:[#allocation5 + $0x430] ss:$24 sps:$4 sm:$0xff]  }
 0x11e   :  { %2160 = vmatpush1.bf16.msra.mxu0 %v4948_v44  ;;  %2079 = vmatprep.subr.bf16.mxu1 %v4953_v45  ;;  %v5043_v44 = vld [vmem:[#allocation5 + $0x75c] ss:$24 sps:$4 sm:$0xff]  }
 0x11f   :  { %2161 = vmatprep.subr.bf16.mxu0 %v4956_v46  ;;  %v5046_v45 = vld [vmem:[#allocation5 + $0x464] ss:$24 sps:$4 sm:$0xff]   ;;  %v5041_v46 = vld [vmem:[#allocation5 + $0x758] ss:$24 sps:$4 sm:$0xff]  }
 0x121   :  { %2080 = vmatpush1.bf16.msra.mxu1 %v4951_v48  ;;  %v5044_v48 = vld [vmem:[#allocation5 + $0x460] ss:$24 sps:$4 sm:$0xff]  }
 0x122   :  { %2162 = vmatpush1.bf16.msra.mxu0 %v4954_v49  ;;  %2081 = vmatprep.subr.bf16.mxu1 %v4959_v50  ;;  %v5049_v49 = vld [vmem:[#allocation5 + $0x78c] ss:$24 sps:$4 sm:$0xff]  }
 0x123   :  { %2163 = vmatprep.subr.bf16.mxu0 %v4962_v52  ;;  %v5052_v50 = vld [vmem:[#allocation5 + $0x494] ss:$24 sps:$4 sm:$0xff]   ;;  %v5047_v52 = vld [vmem:[#allocation5 + $0x788] ss:$24 sps:$4 sm:$0xff]  }
 0x125   :  { %2082 = vmatpush1.bf16.msra.mxu1 %v4957_v53  ;;  %v5050_v53 = vld [vmem:[#allocation5 + $0x490] ss:$24 sps:$4 sm:$0xff]  }
 0x126   :  { %2164 = vmatpush1.bf16.msra.mxu0 %v4960_v54  ;;  %2083 = vmatprep.subr.bf16.mxu1 %v4965_v55  ;;  %v5055_v54 = vld [vmem:[#allocation5 + $0x7bc] ss:$24 sps:$4 sm:$0xff]  }
 0x127   :  { %2165 = vmatprep.subr.bf16.mxu0 %v4968_v56  ;;  %v5058_v55 = vld [vmem:[#allocation5 + $0x4c4] ss:$24 sps:$4 sm:$0xff]   ;;  %v5053_v56 = vld [vmem:[#allocation5 + $0x7b8] ss:$24 sps:$4 sm:$0xff]  }
 0x129   :  { %2084 = vmatpush1.bf16.msra.mxu1 %v4963_v57  ;;  %v5056_v57 = vld [vmem:[#allocation5 + $0x4c0] ss:$24 sps:$4 sm:$0xff]  }
 0x12a   :  { %2166 = vmatpush1.bf16.msra.mxu0 %v4966_v58  ;;  %2085 = vmatprep.subr.bf16.mxu1 %v4971_v59  ;;  %v5061_v58 = vld [vmem:[#allocation5 + $0x7ec] ss:$24 sps:$4 sm:$0xff]  }
 0x12b   :  { %2167 = vmatprep.subr.bf16.mxu0 %v4974_v60  ;;  %v5064_v59 = vld [vmem:[#allocation5 + $0x4f4] ss:$24 sps:$4 sm:$0xff]   ;;  %v5059_v60 = vld [vmem:[#allocation5 + $0x7e8] ss:$24 sps:$4 sm:$0xff]  }
 0x12d   :  { %2086 = vmatpush1.bf16.msra.mxu1 %v4969_v61  ;;  %v5062_v61 = vld [vmem:[#allocation5 + $0x4f0] ss:$24 sps:$4 sm:$0xff]  }
 0x12e   :  { %2168 = vmatpush1.bf16.msra.mxu0 %v4972_v62  ;;  %2087 = vmatprep.subr.bf16.mxu1 %v4977_v63  ;;  %v5067_v62 = vld [vmem:[#allocation5 + $0x81c] ss:$24 sps:$4 sm:$0xff]  }
 0x12f   :  { %2169 = vmatprep.subr.bf16.mxu0 %v4980_v0  ;;  %v5070_v63 = vld [vmem:[#allocation5 + $0x524] ss:$24 sps:$4 sm:$0xff]   ;;  %v5065_v0 = vld [vmem:[#allocation5 + $0x818] ss:$24 sps:$4 sm:$0xff]  }
 0x131   :  { %2088 = vmatpush1.bf16.msra.mxu1 %v4975_v1  ;;  %v5068_v1 = vld [vmem:[#allocation5 + $0x520] ss:$24 sps:$4 sm:$0xff]  }
 0x132   :  { %2170 = vmatpush1.bf16.msra.mxu0 %v4978_v2  ;;  %2089 = vmatprep.subr.bf16.mxu1 %v4983_v3  ;;  %v5073_v2 = vld [vmem:[#allocation5 + $0x84c] ss:$24 sps:$4 sm:$0xff]  }
 0x133   :  { %2171 = vmatprep.subr.bf16.mxu0 %v4986_v4  ;;  %v5076_v3 = vld [vmem:[#allocation5 + $0x554] ss:$24 sps:$4 sm:$0xff]   ;;  %v5071_v4 = vld [vmem:[#allocation5 + $0x848] ss:$24 sps:$4 sm:$0xff]  }
 0x135   :  { %2090 = vmatpush1.bf16.msra.mxu1 %v4981_v5  ;;  %v5074_v5 = vld [vmem:[#allocation5 + $0x550] ss:$24 sps:$4 sm:$0xff]  }
 0x136   :  { %2172 = vmatpush1.bf16.msra.mxu0 %v4984_v8  ;;  %2091 = vmatprep.subr.bf16.mxu1 %v4989_v9  ;;  %v5079_v8 = vld [vmem:[#allocation5 + $0x87c] ss:$24 sps:$4 sm:$0xff]  }
 0x137   :  { %2173 = vmatprep.subr.bf16.mxu0 %v4992_v10  ;;  %v5082_v9 = vld [vmem:[#allocation5 + $0x584] ss:$24 sps:$4 sm:$0xff]   ;;  %v5077_v10 = vld [vmem:[#allocation5 + $0x878] ss:$24 sps:$4 sm:$0xff]  }
 0x139   :  { %2092 = vmatpush1.bf16.msra.mxu1 %v4987_v11  ;;  %v5080_v11 = vld [vmem:[#allocation5 + $0x580] ss:$24 sps:$4 sm:$0xff]  }
 0x13a   :  { %2174 = vmatpush1.bf16.msra.mxu0 %v4990_v12  ;;  %2093 = vmatprep.subr.bf16.mxu1 %v4995_v13  ;;  %v5085_v12 = vld [vmem:[#allocation5 + $0x8ac] ss:$24 sps:$4 sm:$0xff]  }
 0x13b   :  { %2175 = vmatprep.subr.bf16.mxu0 %v4998_v15  ;;  %v5088_v13 = vld [vmem:[#allocation5 + $0x5b4] ss:$24 sps:$4 sm:$0xff]   ;;  %v5083_v15 = vld [vmem:[#allocation5 + $0x8a8] ss:$24 sps:$4 sm:$0xff]  }
 0x13d   :  { %2094 = vmatpush1.bf16.msra.mxu1 %v4993_v16  ;;  %v5086_v16 = vld [vmem:[#allocation5 + $0x5b0] ss:$24 sps:$4 sm:$0xff]  }
 0x13e   :  { %2176 = vmatpush1.bf16.msra.mxu0 %v4996_v17  ;;  %2104 = vmatprep.subr.bf16.mxu1 %v5001_v18  ;;  %v5091_v17 = vld [vmem:[#allocation5 + $0x8dc] ss:$24 sps:$4 sm:$0xff]  }
 0x13f   :  { %2186 = vmatprep.subr.bf16.mxu0 %v5004_v19  ;;  %v5094_v18 = vld [vmem:[#allocation5 + $0x5e4] ss:$24 sps:$4 sm:$0xff]   ;;  %v5089_v19 = vld [vmem:[#allocation5 + $0x8d8] ss:$24 sps:$4 sm:$0xff]  }
 0x140   :  { %2096 = vmatmul.mubr.bf16.vlgmr.msra.gmra.mrb[4].mxu1 %v5811_v7 }
 0x141   :  { %2178 = vmatmul.mubr.bf16.vlgmr.msra.gmra.mrb[4].mxu0 %v5809_v6  ;;  %2105 = vmatpush1.bf16.msra.mxu1 %v4999_v20  ;;  %v5022_v6 = vld [vmem:[#allocation5 + $0x3a4] ss:$24 sps:$4 sm:$0xff]   ;;  %v5092_v20 = vld [vmem:[#allocation5 + $0x5e0] ss:$24 sps:$4 sm:$0xff]  }
 0x142   :  { %2187 = vmatpush1.bf16.msra.mxu0 %v5002_v21  ;;  %2106 = vmatprep.subr.bf16.mxu1 %v5007_v22  ;;  %v5097_v21 = vld [vmem:[#allocation5 + $0x614] ss:$24 sps:$4 sm:$0xff]  }
 0x143   :  { %2188 = vmatprep.subr.bf16.mxu0 %v5010_v23  ;;  %2136 = vmatprep.mubr.bf16.mxu1 %v5820_v34  ;;  %v5127_v22 = vld [vmem:[#allocation8 + $0x4] ss:$16 sps:$4 sm:$0xff]  }
 0x144   :  { %2218 = vmatprep.mubr.bf16.mxu0 %v5805_v51  ;;  %v5031_v51 = vld [vmem:[#allocation5 + $0x6fc] ss:$24 sps:$4 sm:$0xff]   ;;  %v5095_v23 = vld [vmem:[#allocation5 + $0x610] ss:$24 sps:$4 sm:$0xff]  }
 0x145   :  { %2107 = vmatpush1.bf16.msra.mxu1 %v5005_v24  ;;  %v5125_v24 = vld [vmem:[#allocation8] ss:$16 sps:$4 sm:$0xff]  }
 0x146   :  { %2189 = vmatpush1.bf16.msra.mxu0 %v5008_v25  ;;  %2108 = vmatprep.subr.bf16.mxu1 %v5013_v26  ;;  %v5100_v25 = vld [vmem:[#allocation5 + $0x644] ss:$24 sps:$4 sm:$0xff]  }
 0x147   :  { %2190 = vmatprep.subr.bf16.mxu0 %v5016_v27  ;;  %v5133_v26 = vld [vmem:[#allocation8 + $0x24] ss:$16 sps:$4 sm:$0xff]  }
 0x148   :  { %v5098_v27 = vld [vmem:[#allocation5 + $0x640] ss:$24 sps:$4 sm:$0xff]  }
 0x149   :  { %2109 = vmatpush1.bf16.msra.mxu1 %v5011_v28  ;;  %v5131_v28 = vld [vmem:[#allocation8 + $0x20] ss:$16 sps:$4 sm:$0xff]  }
 0x14a   :  { %2191 = vmatpush1.bf16.msra.mxu0 %v5014_v29  ;;  %2110 = vmatprep.subr.bf16.mxu1 %v5019_v30  ;;  %v5103_v29 = vld [vmem:[#allocation5 + $0x674] ss:$24 sps:$4 sm:$0xff]  }
 0x14b   :  { %2192 = vmatprep.subr.bf16.mxu0 %v5022_v6  ;;  %v5139_v30 = vld [vmem:[#allocation8 + $0x44] ss:$16 sps:$4 sm:$0xff]  }
 0x14c   :  { %v5101_v6 = vld [vmem:[#allocation5 + $0x670] ss:$24 sps:$4 sm:$0xff]  }
 0x14d   :  { %2111 = vmatpush1.bf16.msra.mxu1 %v5017_v31  ;;  %v5106_v31 = vld [vmem:[#allocation5 + $0x6a4] ss:$24 sps:$4 sm:$0xff]  }
 0x14e   :  { %2193 = vmatpush1.bf16.msra.mxu0 %v5020_v47  ;;  %2112 = vmatprep.subr.bf16.mxu1 %v5025_v32  ;;  %v5137_v47 = vld [vmem:[#allocation8 + $0x40] ss:$16 sps:$4 sm:$0xff]   ;;  %v5145_v32 = vld [vmem:[#allocation8 + $0x64] ss:$16 sps:$4 sm:$0xff]  }
 0x14f   :  { %2194 = vmatprep.subr.bf16.mxu0 %v5028_v33  ;;  %v5109_v33 = vld [vmem:[#allocation5 + $0x6d4] ss:$24 sps:$4 sm:$0xff]  }
 0x151   :  { %2113 = vmatpush1.bf16.msra.mxu1 %v5023_v35  ;;  %v5143_v35 = vld [vmem:[#allocation8 + $0x60] ss:$16 sps:$4 sm:$0xff]  }
 0x152   :  { %2195 = vmatpush1.bf16.msra.mxu0 %v5026_v36  ;;  %2114 = vmatprep.subr.bf16.mxu1 %v5031_v51  ;;  %v5151_v36 = vld [vmem:[#allocation8 + $0x84] ss:$16 sps:$4 sm:$0xff]  }
 0x153   :  { %2196 = vmatprep.subr.bf16.mxu0 %v5034_v37  ;;  %v5107_v51 = vld [vmem:[#allocation5 + $0x6d0] ss:$24 sps:$4 sm:$0xff]   ;;  %v5112_v37 = vld [vmem:[#allocation5 + $0x704] ss:$24 sps:$4 sm:$0xff]  }
 0x155   :  { %2115 = vmatpush1.bf16.msra.mxu1 %v5029_v38  ;;  %v5157_v38 = vld [vmem:[#allocation8 + $0xa4] ss:$16 sps:$4 sm:$0xff]  }
 0x156   :  { %2197 = vmatpush1.bf16.msra.mxu0 %v5032_v39  ;;  %2116 = vmatprep.subr.bf16.mxu1 %v5037_v40  ;;  %v5110_v39 = vld [vmem:[#allocation5 + $0x700] ss:$24 sps:$4 sm:$0xff]   ;;  %v5115_v40 = vld [vmem:[#allocation5 + $0x734] ss:$24 sps:$4 sm:$0xff]  }
 0x157   :  { %2198 = vmatprep.subr.bf16.mxu0 %v5040_v41  ;;  %v5155_v41 = vld [vmem:[#allocation8 + $0xa0] ss:$16 sps:$4 sm:$0xff]  }
 0x159   :  { %2117 = vmatpush1.bf16.msra.mxu1 %v5035_v42  ;;  %v5163_v42 = vld [vmem:[#allocation8 + $0xc4] ss:$16 sps:$4 sm:$0xff]  }
 0x15a   :  { %2199 = vmatpush1.bf16.msra.mxu0 %v5038_v43  ;;  %2118 = vmatprep.subr.bf16.mxu1 %v5043_v44 }
 0x15b   :  { %2200 = vmatprep.subr.bf16.mxu0 %v5046_v45 }
 0x15d   :  { %2119 = vmatpush1.bf16.msra.mxu1 %v5041_v46  ;;  %v5113_v46 = vld [vmem:[#allocation5 + $0x730] ss:$24 sps:$4 sm:$0xff]  }
 0x15e   :  { %2201 = vmatpush1.bf16.msra.mxu0 %v5044_v48  ;;  %2120 = vmatprep.subr.bf16.mxu1 %v5049_v49  ;;  %v5161_v48 = vld [vmem:[#allocation8 + $0xc0] ss:$16 sps:$4 sm:$0xff]  }
 0x15f   :  { %2202 = vmatprep.subr.bf16.mxu0 %v5052_v50  ;;  %v5118_v50 = vld [vmem:[#allocation5 + $0x764] ss:$24 sps:$4 sm:$0xff]  }
 0x161   :  { %2121 = vmatpush1.bf16.msra.mxu1 %v5047_v52  ;;  %v5169_v52 = vld [vmem:[#allocation8 + $0xe4] ss:$16 sps:$4 sm:$0xff]  }
 0x162   :  { %2203 = vmatpush1.bf16.msra.mxu0 %v5050_v53  ;;  %2122 = vmatprep.subr.bf16.mxu1 %v5055_v54  ;;  %v5116_v53 = vld [vmem:[#allocation5 + $0x760] ss:$24 sps:$4 sm:$0xff]   ;;  %v5121_v54 = vld [vmem:[#allocation5 + $0x794] ss:$24 sps:$4 sm:$0xff]  }
 0x163   :  { %2204 = vmatprep.subr.bf16.mxu0 %v5058_v55  ;;  %v5167_v55 = vld [vmem:[#allocation8 + $0xe0] ss:$16 sps:$4 sm:$0xff]  }
 0x165   :  { %2123 = vmatpush1.bf16.msra.mxu1 %v5053_v56  ;;  %v5175_v56 = vld [vmem:[#allocation8 + $0x104] ss:$16 sps:$4 sm:$0xff]  }
 0x166   :  { %2205 = vmatpush1.bf16.msra.mxu0 %v5056_v57  ;;  %2124 = vmatprep.subr.bf16.mxu1 %v5061_v58  ;;  %v5119_v57 = vld [vmem:[#allocation5 + $0x790] ss:$24 sps:$4 sm:$0xff]   ;;  %v5124_v58 = vld [vmem:[#allocation5 + $0x7c4] ss:$24 sps:$4 sm:$0xff]  }
 0x167   :  { %2206 = vmatprep.subr.bf16.mxu0 %v5064_v59  ;;  %v5173_v59 = vld [vmem:[#allocation8 + $0x100] ss:$16 sps:$4 sm:$0xff]  }
 0x169   :  { %2125 = vmatpush1.bf16.msra.mxu1 %v5059_v60  ;;  %v5181_v60 = vld [vmem:[#allocation8 + $0x124] ss:$16 sps:$4 sm:$0xff]  }
 0x16a   :  { %2207 = vmatpush1.bf16.msra.mxu0 %v5062_v61  ;;  %2126 = vmatprep.subr.bf16.mxu1 %v5067_v62  ;;  %v5122_v61 = vld [vmem:[#allocation5 + $0x7c0] ss:$24 sps:$4 sm:$0xff]   ;;  %v5130_v62 = vld [vmem:[#allocation5 + $0x7f4] ss:$24 sps:$4 sm:$0xff]  }
 0x16b   :  { %2208 = vmatprep.subr.bf16.mxu0 %v5070_v63  ;;  %v5179_v63 = vld [vmem:[#allocation8 + $0x120] ss:$16 sps:$4 sm:$0xff]  }
 0x16d   :  { %2127 = vmatpush1.bf16.msra.mxu1 %v5065_v0  ;;  %v5187_v0 = vld [vmem:[#allocation8 + $0x144] ss:$16 sps:$4 sm:$0xff]  }
 0x16e   :  { %2209 = vmatpush1.bf16.msra.mxu0 %v5068_v1  ;;  %2128 = vmatprep.subr.bf16.mxu1 %v5073_v2  ;;  %v5128_v1 = vld [vmem:[#allocation5 + $0x7f0] ss:$24 sps:$4 sm:$0xff]   ;;  %v5136_v2 = vld [vmem:[#allocation5 + $0x824] ss:$24 sps:$4 sm:$0xff]  }
 0x16f   :  { %2210 = vmatprep.subr.bf16.mxu0 %v5076_v3  ;;  %v5185_v3 = vld [vmem:[#allocation8 + $0x140] ss:$16 sps:$4 sm:$0xff]  }
 0x171   :  { %2129 = vmatpush1.bf16.msra.mxu1 %v5071_v4  ;;  %v5193_v4 = vld [vmem:[#allocation8 + $0x164] ss:$16 sps:$4 sm:$0xff]  }
 0x172   :  { %2211 = vmatpush1.bf16.msra.mxu0 %v5074_v5  ;;  %2130 = vmatprep.subr.bf16.mxu1 %v5079_v8  ;;  %v5134_v5 = vld [vmem:[#allocation5 + $0x820] ss:$24 sps:$4 sm:$0xff]   ;;  %v5142_v8 = vld [vmem:[#allocation5 + $0x854] ss:$24 sps:$4 sm:$0xff]  }
 0x173   :  { %2212 = vmatprep.subr.bf16.mxu0 %v5082_v9  ;;  %v5191_v9 = vld [vmem:[#allocation8 + $0x160] ss:$16 sps:$4 sm:$0xff]  }
 0x175   :  { %2131 = vmatpush1.bf16.msra.mxu1 %v5077_v10  ;;  %v5199_v10 = vld [vmem:[#allocation8 + $0x184] ss:$16 sps:$4 sm:$0xff]  }
 0x176   :  { %2213 = vmatpush1.bf16.msra.mxu0 %v5080_v11  ;;  %2132 = vmatprep.subr.bf16.mxu1 %v5085_v12  ;;  %v5140_v11 = vld [vmem:[#allocation5 + $0x850] ss:$24 sps:$4 sm:$0xff]  }
 0x177   :  { %2214 = vmatprep.subr.bf16.mxu0 %v5088_v13  ;;  %v5197_v12 = vld [vmem:[#allocation8 + $0x180] ss:$16 sps:$4 sm:$0xff]  }
 0x178   :  { %v5148_v13 = vld [vmem:[#allocation5 + $0x884] ss:$24 sps:$4 sm:$0xff]  }
 0x179   :  { %2133 = vmatpush1.bf16.msra.mxu1 %v5083_v15  ;;  %v5205_v15 = vld [vmem:[#allocation8 + $0x1a4] ss:$16 sps:$4 sm:$0xff]  }
 0x17a   :  { %2215 = vmatpush1.bf16.msra.mxu0 %v5086_v16  ;;  %2134 = vmatprep.subr.bf16.mxu1 %v5091_v17  ;;  %v5146_v16 = vld [vmem:[#allocation5 + $0x880] ss:$24 sps:$4 sm:$0xff]  }
 0x17b   :  { %2216 = vmatprep.subr.bf16.mxu0 %v5094_v18  ;;  %v5203_v17 = vld [vmem:[#allocation8 + $0x1a0] ss:$16 sps:$4 sm:$0xff]  }
 0x17c   :  { %v5154_v18 = vld [vmem:[#allocation5 + $0x8b4] ss:$24 sps:$4 sm:$0xff]  }
 0x17d   :  { %2135 = vmatpush1.bf16.msra.mxu1 %v5089_v19  ;;  %v5211_v19 = vld [vmem:[#allocation8 + $0x1c4] ss:$16 sps:$4 sm:$0xff]  }
 0x17e   :  { %2217 = vmatpush1.bf16.msra.mxu0 %v5092_v20  ;;  %3454 = vmatprep.subr.bf16.mxu1 %v5127_v22  ;;  %v5152_v20 = vld [vmem:[#allocation5 + $0x8b0] ss:$24 sps:$4 sm:$0xff]   ;;  %v5160_v22 = vld [vmem:[#allocation5 + $0x8e4] ss:$24 sps:$4 sm:$0xff]  }
 0x17f   :  { %2227 = vmatprep.subr.bf16.mxu0 %v5097_v21  ;;  %v5209_v21 = vld [vmem:[#allocation8 + $0x1c0] ss:$16 sps:$4 sm:$0xff]  }
 0x180   :  { %2137 = vmatmul.mubr.bf16.vlgmr.msra.gmra.mrb[4].mxu1 %v5825_v14 }
 0x181   :  { %2219 = vmatmul.mubr.bf16.vlgmr.msra.gmra.mrb[4].mxu0 %v5811_v7  ;;  %3455 = vmatpush1.bf16.msra.mxu1 %v5125_v24  ;;  %v5104_v7 = vld [vmem:[#allocation5 + $0x6a0] ss:$24 sps:$4 sm:$0xff]  }
 0x182   :  { %2228 = vmatpush1.bf16.msra.mxu0 %v5095_v23  ;;  %3456 = vmatprep.subr.bf16.mxu1 %v5133_v26  ;;  %v5217_v23 = vld [vmem:[#allocation8 + $0x1e4] ss:$16 sps:$4 sm:$0xff]   ;;  %v5166_v26 = vld [vmem:[#allocation8 + $0xc] ss:$16 sps:$4 sm:$0xff]  }
 0x183   :  { %2229 = vmatprep.subr.bf16.mxu0 %v5100_v25  ;;  %2259 = vmatprep.mubr.bf16.mxu0 %v5820_v34  ;;  %v5149_v34 = vld [vmem:[#allocation8 + $0x80] ss:$16 sps:$4 sm:$0xff]  }
 0x184   :  { %v5158_v24 = vld [vmem:[#allocation5 + $0x8e0] ss:$24 sps:$4 sm:$0xff]  }
 0x185   :  { %3457 = vmatpush1.bf16.msra.mxu1 %v5131_v28  ;;  %v5215_v25 = vld [vmem:[#allocation8 + $0x1e0] ss:$16 sps:$4 sm:$0xff]   ;;  %v5164_v28 = vld [vmem:[#allocation8 + $0x8] ss:$16 sps:$4 sm:$0xff]  }
 0x186   :  { %2230 = vmatpush1.bf16.msra.mxu0 %v5098_v27  ;;  %3458 = vmatprep.subr.bf16.mxu1 %v5139_v30  ;;  %v5241_v27 = vld [vmem:[#allocation8 + $0x204] ss:$16 sps:$4 sm:$0xff]   ;;  %v5170_v30 = vld [vmem:[#allocation8 + $0x28] ss:$16 sps:$4 sm:$0xff]  }
 0x187   :  { %2231 = vmatprep.subr.bf16.mxu0 %v5103_v29  ;;  %v5172_v29 = vld [vmem:[#allocation8 + $0x2c] ss:$16 sps:$4 sm:$0xff]  }
 0x189   :  { %3459 = vmatpush1.bf16.msra.mxu1 %v5137_v47  ;;  %v5176_v47 = vld [vmem:[#allocation8 + $0x48] ss:$16 sps:$4 sm:$0xff]  }
 0x18a   :  { %2232 = vmatpush1.bf16.msra.mxu0 %v5101_v6  ;;  %3460 = vmatprep.subr.bf16.mxu1 %v5145_v32  ;;  %v408_v6 = vlaneseq }
 0x18b   :  { %2233 = vmatprep.subr.bf16.mxu0 %v5106_v31  ;;  %v5178_v31 = vld [vmem:[#allocation8 + $0x4c] ss:$16 sps:$4 sm:$0xff]  }
 0x18c   :  { %v5843_v32 = vshrl.u32 %v408_v6, 7  ;;  %v5281_v6 = vld [vmem:[#allocation8 + $0x2e0] ss:$16 sps:$4 sm:$0xff]  }
 0x18d   :  { %3461 = vmatpush1.bf16.msra.mxu1 %v5143_v35 }
 0x18e   :  { %2234 = vmatpush1.bf16.msra.mxu0 %v5104_v7  ;;  %3462 = vmatprep.subr.bf16.mxu1 %v5151_v36  ;;  %v5184_v7 = vld [vmem:[#allocation8 + $0x6c] ss:$16 sps:$4 sm:$0xff]   ;;  %v410_v35 = vsub.s32 0, %v5843_v32 }
 0x18f   :  { %2235 = vmatprep.subr.bf16.mxu0 %v5109_v33  ;;  %v5182_v33 = vld [vmem:[#allocation8 + $0x68] ss:$16 sps:$4 sm:$0xff]   ;;  %v5190_v36 = vld [vmem:[#allocation8 + $0x8c] ss:$16 sps:$4 sm:$0xff]  }
 0x191   :  { %3463 = vmatpush1.bf16.msra.mxu1 %v5149_v34 }
 0x192   :  { %2236 = vmatpush1.bf16.msra.mxu0 %v5107_v51  ;;  %3464 = vmatprep.subr.bf16.mxu1 %v5157_v38  ;;  %v5846_v51 = vld [vmem:[#allocation7] sm:$0x3f] }
 0x193   :  { %2237 = vmatprep.subr.bf16.mxu0 %v5112_v37  ;;  %v5838_v43 = vpop.f32.mrb[0].mxu1  ;;  %v5188_v37 = vld [vmem:[#allocation8 + $0x88] ss:$16 sps:$4 sm:$0xff]   ;;  %v411_v34 = vrot.slane %v5846_v51, %v410_v35  ;;  %v5196_v38 = vld [vmem:[#allocation8 + $0xac] ss:$16 sps:$4 sm:$0xff]  }
 0x194   :  { %v5840_v44 = vpop.f32.mrb[1].mxu1 }
 0x195   :  { %v1937_v45 = vpop.f32.mrb[2].mxu1  ;;  %3465 = vmatpush1.bf16.msra.mxu1 %v5155_v41  ;;  %v1934_v41 = vadd.f32 %v5838_v43, %v411_v34  ;;  %v5214_v43 = vld [vmem:[#allocation8 + $0x10c] ss:$16 sps:$4 sm:$0xff]  }
 0x196   :  { %2238 = vmatpush1.bf16.msra.mxu0 %v5110_v39  ;;  %v1938_v49 = vpop.f32.mrb[3].mxu1  ;;  %3466 = vmatprep.subr.bf16.mxu1 %v5163_v42  ;;  %v5202_v42 = vld [vmem:[#allocation8 + $0xcc] ss:$16 sps:$4 sm:$0xff]  }
 0x197   :  { %2239 = vmatprep.subr.bf16.mxu0 %v5115_v40  ;;  %v5194_v40 = vld [vmem:[#allocation8 + $0xa8] ss:$16 sps:$4 sm:$0xff]   ;;  %v5262_v34 = vld [vmem:[#allocation8 + $0x26c] ss:$16 sps:$4 sm:$0xff]  }
 0x199   :  { %3467 = vmatpush1.bf16.msra.mxu1 %v5161_v48 }
 0x19a   :  { %2240 = vmatpush1.bf16.msra.mxu0 %v5113_v46  ;;  %3468 = vmatprep.subr.bf16.mxu1 %v5169_v52 }
 0x19b   :  { %2241 = vmatprep.subr.bf16.mxu0 %v5118_v50 }
 0x19d   :  { %3469 = vmatpush1.bf16.msra.mxu1 %v5167_v55  ;;  %v5208_v55 = vld [vmem:[#allocation8 + $0xec] ss:$16 sps:$4 sm:$0xff]  }
 0x19e   :  { %2242 = vmatpush1.bf16.msra.mxu0 %v5116_v53  ;;  %3470 = vmatprep.subr.bf16.mxu1 %v5175_v56  ;;  %v5200_v53 = vld [vmem:[#allocation8 + $0xc8] ss:$16 sps:$4 sm:$0xff]  }
 0x19f   :  { %2243 = vmatprep.subr.bf16.mxu0 %v5121_v54  ;;  %v5206_v56 = vld [vmem:[#allocation8 + $0xe8] ss:$16 sps:$4 sm:$0xff]  }
 0x1a1   :  { %3471 = vmatpush1.bf16.msra.mxu1 %v5173_v59 }
 0x1a2   :  { %2244 = vmatpush1.bf16.msra.mxu0 %v5119_v57  ;;  %3472 = vmatprep.subr.bf16.mxu1 %v5181_v60  ;;  %v5212_v57 = vld [vmem:[#allocation8 + $0x108] ss:$16 sps:$4 sm:$0xff]  }
 0x1a3   :  { %2245 = vmatprep.subr.bf16.mxu0 %v5124_v58  ;;  %v5218_v60 = vld [vmem:[#allocation8 + $0x128] ss:$16 sps:$4 sm:$0xff]  }
 0x1a5   :  { %3473 = vmatpush1.bf16.msra.mxu1 %v5179_v63  ;;  %v5239_v63 = vld [vmem:[#allocation8 + $0x200] ss:$16 sps:$4 sm:$0xff]  }
 0x1a6   :  { %2246 = vmatpush1.bf16.msra.mxu0 %v5122_v61  ;;  %3474 = vmatprep.subr.bf16.mxu1 %v5187_v0 }
 0x1a7   :  { %2247 = vmatprep.subr.bf16.mxu0 %v5130_v62  ;;  %v5223_v62 = vld [vmem:[#allocation8 + $0x14c] ss:$16 sps:$4 sm:$0xff]  }
 0x1a9   :  { %3475 = vmatpush1.bf16.msra.mxu1 %v5185_v3  ;;  %v5226_v3 = vld [vmem:[#allocation8 + $0x16c] ss:$16 sps:$4 sm:$0xff]  }
 0x1aa   :  { %2248 = vmatpush1.bf16.msra.mxu0 %v5128_v1  ;;  %3476 = vmatprep.subr.bf16.mxu1 %v5193_v4  ;;  %v5247_v1 = vld [vmem:[#allocation8 + $0x224] ss:$16 sps:$4 sm:$0xff]   ;;  %v5245_v4 = vld [vmem:[#allocation8 + $0x220] ss:$16 sps:$4 sm:$0xff]  }
 0x1ab   :  { %2249 = vmatprep.subr.bf16.mxu0 %v5136_v2  ;;  %v5221_v2 = vld [vmem:[#allocation8 + $0x148] ss:$16 sps:$4 sm:$0xff]  }
 0x1ad   :  { %3477 = vmatpush1.bf16.msra.mxu1 %v5191_v9  ;;  %v5229_v9 = vld [vmem:[#allocation8 + $0x18c] ss:$16 sps:$4 sm:$0xff]  }
 0x1ae   :  { %2250 = vmatpush1.bf16.msra.mxu0 %v5134_v5  ;;  %3478 = vmatprep.subr.bf16.mxu1 %v5199_v10  ;;  %v5253_v5 = vld [vmem:[#allocation8 + $0x244] ss:$16 sps:$4 sm:$0xff]   ;;  %v5251_v10 = vld [vmem:[#allocation8 + $0x240] ss:$16 sps:$4 sm:$0xff]  }
 0x1af   :  { %2251 = vmatprep.subr.bf16.mxu0 %v5142_v8  ;;  %v5224_v8 = vld [vmem:[#allocation8 + $0x168] ss:$16 sps:$4 sm:$0xff]  }
 0x1b1   :  { %3479 = vmatpush1.bf16.msra.mxu1 %v5197_v12  ;;  %v5227_v12 = vld [vmem:[#allocation8 + $0x188] ss:$16 sps:$4 sm:$0xff]  }
 0x1b2   :  { %2252 = vmatpush1.bf16.msra.mxu0 %v5140_v11  ;;  %3480 = vmatprep.subr.bf16.mxu1 %v5205_v15  ;;  %v5259_v11 = vld [vmem:[#allocation8 + $0x264] ss:$16 sps:$4 sm:$0xff]   ;;  %v5257_v15 = vld [vmem:[#allocation8 + $0x260] ss:$16 sps:$4 sm:$0xff]  }
 0x1b3   :  { %2253 = vmatprep.subr.bf16.mxu0 %v5148_v13  ;;  %v5232_v13 = vld [vmem:[#allocation8 + $0x1ac] ss:$16 sps:$4 sm:$0xff]  }
 0x1b5   :  { %3481 = vmatpush1.bf16.msra.mxu1 %v5203_v17  ;;  %v5230_v17 = vld [vmem:[#allocation8 + $0x1a8] ss:$16 sps:$4 sm:$0xff]  }
 0x1b6   :  { %2254 = vmatpush1.bf16.msra.mxu0 %v5146_v16  ;;  %3482 = vmatprep.subr.bf16.mxu1 %v5211_v19  ;;  %v5265_v16 = vld [vmem:[#allocation8 + $0x284] ss:$16 sps:$4 sm:$0xff]   ;;  %v5263_v19 = vld [vmem:[#allocation8 + $0x280] ss:$16 sps:$4 sm:$0xff]  }
 0x1b7   :  { %2255 = vmatprep.subr.bf16.mxu0 %v5154_v18  ;;  %v5235_v18 = vld [vmem:[#allocation8 + $0x1cc] ss:$16 sps:$4 sm:$0xff]  }
 0x1b9   :  { %3483 = vmatpush1.bf16.msra.mxu1 %v5209_v21  ;;  %v5233_v21 = vld [vmem:[#allocation8 + $0x1c8] ss:$16 sps:$4 sm:$0xff]  }
 0x1ba   :  { %2256 = vmatpush1.bf16.msra.mxu0 %v5152_v20  ;;  %3484 = vmatprep.subr.bf16.mxu1 %v5217_v23  ;;  %v5271_v20 = vld [vmem:[#allocation8 + $0x2a4] ss:$16 sps:$4 sm:$0xff]   ;;  %v5269_v23 = vld [vmem:[#allocation8 + $0x2a0] ss:$16 sps:$4 sm:$0xff]  }
 0x1bb   :  { %2257 = vmatprep.subr.bf16.mxu0 %v5160_v22  ;;  %v5238_v22 = vld [vmem:[#allocation8 + $0x1ec] ss:$16 sps:$4 sm:$0xff]  }
 0x1bd   :  { %3485 = vmatpush1.bf16.msra.mxu1 %v5215_v25  ;;  %v5236_v25 = vld [vmem:[#allocation8 + $0x1e8] ss:$16 sps:$4 sm:$0xff]  }
 0x1be   :  { %2258 = vmatpush1.bf16.msra.mxu0 %v5158_v24  ;;  %3495 = vmatprep.subr.bf16.mxu1 %v5241_v27  ;;  %v5277_v24 = vld [vmem:[#allocation8 + $0x2c4] ss:$16 sps:$4 sm:$0xff]   ;;  %v5275_v27 = vld [vmem:[#allocation8 + $0x2c0] ss:$16 sps:$4 sm:$0xff]  }
 0x1bf   :  { %3577 = vmatprep.subr.bf16.mxu0 %v5166_v26  ;;  %v5244_v26 = vld [vmem:[#allocation8 + $0x20c] ss:$16 sps:$4 sm:$0xff]  }
 0x1c1   :  { %2260 = vmatmul.mubr.bf16.vlgmr.msra.gmra.mrb[4].mxu0 %v5825_v14  ;;  %v414_v14 = vsub.s32 1, %v5843_v32 }
 0x1c2   :  { %3578 = vmatpush1.bf16.msra.mxu0 %v5164_v28  ;;  %v5283_v28 = vld [vmem:[#allocation8 + $0x2e4] ss:$16 sps:$4 sm:$0xff]  }
 0x1c3   :  { %3579 = vmatprep.subr.bf16.mxu0 %v5172_v29  ;;  %v415_v39 = vrot.slane %v5846_v51, %v414_v14  ;;  %v5242_v29 = vld [vmem:[#allocation8 + $0x208] ss:$16 sps:$4 sm:$0xff]  }
 0x1c5   :  { %v1936_v45 = vadd.f32 %v5840_v44, %v415_v39  ;;  %v5220_v44 = vld [vmem:[#allocation8 + $0x12c] ss:$16 sps:$4 sm:$0xff]   ;;  %v5301_v39 = vld [vmem:[#allocation8 + $0x344] ss:$16 sps:$4 sm:$0xff]  }
 0x1c6   :  { %3580 = vmatpush1.bf16.msra.mxu0 %v5170_v30  ;;  %v5250_v30 = vld [vmem:[#allocation8 + $0x22c] ss:$16 sps:$4 sm:$0xff]  }
 0x1c7   :  { %3581 = vmatprep.subr.bf16.mxu0 %v5178_v31  ;;  %v5289_v31 = vld [vmem:[#allocation8 + $0x304] ss:$16 sps:$4 sm:$0xff]  }
 0x1ca   :  { %3582 = vmatpush1.bf16.msra.mxu0 %v5176_v47  ;;  %v5248_v47 = vld [vmem:[#allocation8 + $0x228] ss:$16 sps:$4 sm:$0xff]  }
 0x1cb   :  { %3583 = vmatprep.subr.bf16.mxu0 %v5184_v7  ;;  %v5256_v7 = vld [vmem:[#allocation8 + $0x24c] ss:$16 sps:$4 sm:$0xff]  }
 0x1ce   :  { %3584 = vmatpush1.bf16.msra.mxu0 %v5182_v33  ;;  %v5287_v33 = vld [vmem:[#allocation8 + $0x300] ss:$16 sps:$4 sm:$0xff]  }
 0x1cf   :  { %3585 = vmatprep.subr.bf16.mxu0 %v5190_v36  ;;  %v5295_v36 = vld [vmem:[#allocation8 + $0x324] ss:$16 sps:$4 sm:$0xff]  }
 0x1d2   :  { %3586 = vmatpush1.bf16.msra.mxu0 %v5188_v37  ;;  %v5254_v37 = vld [vmem:[#allocation8 + $0x248] ss:$16 sps:$4 sm:$0xff]  }
 0x1d3   :  { %3587 = vmatprep.subr.bf16.mxu0 %v5196_v38  ;;  %v5293_v38 = vld [vmem:[#allocation8 + $0x320] ss:$16 sps:$4 sm:$0xff]  }
 0x1d4   :  { %v2015_v46 = vpop.f32.mrb[0].mxu0 }
 0x1d5   :  { %v4644_v48 = vadd.f32 %v2015_v46, %v1934_v41  ;;  %v2017_v49 = vpop.f32.mrb[1].mxu0  ;;  %v5268_v41 = vld [vmem:[#allocation8 + $0x28c] ss:$16 sps:$4 sm:$0xff]   ;;  %v5266_v46 = vld [vmem:[#allocation8 + $0x288] ss:$16 sps:$4 sm:$0xff]  }
 0x1d6   :  { %v4646_v50 = vadd.f32 %v2017_v49, %v1936_v45  ;;  %v2019_v52 = vpop.f32.mrb[2].mxu0  ;;  %3588 = vmatpush1.bf16.msra.mxu0 %v5194_v40  ;;  %v5260_v40 = vld [vmem:[#allocation8 + $0x268] ss:$16 sps:$4 sm:$0xff]   ;;  %v5307_v45 = vld [vmem:[#allocation8 + $0x364] ss:$16 sps:$4 sm:$0xff]  }
 0x1d7   :  { %5463 = vtanh.f32 %v4644_v48  ;;  %v2020_v54 = vpop.f32.mrb[3].mxu0  ;;  %3589 = vmatprep.subr.bf16.mxu0 %v5202_v42  ;;  %v5299_v42 = vld [vmem:[#allocation8 + $0x340] ss:$16 sps:$4 sm:$0xff]   ;;  %v5274_v48 = vld [vmem:[#allocation8 + $0x2ac] ss:$16 sps:$4 sm:$0xff]  }
 0x1d8   :  { %5465 = vtanh.f32 %v4646_v50  ;;  %v5305_v49 = vld [vmem:[#allocation8 + $0x360] ss:$16 sps:$4 sm:$0xff]   ;;  %v5313_v50 = vld [vmem:[#allocation8 + $0x384] ss:$16 sps:$4 sm:$0xff]   ;;  %v5272_v52 = vld [vmem:[#allocation8 + $0x2a8] ss:$16 sps:$4 sm:$0xff]  }
 0x1d9   :  { %v5311_v54 = vld [vmem:[#allocation8 + $0x380] ss:$16 sps:$4 sm:$0xff]  }
 0x1da   :  { %3590 = vmatpush1.bf16.msra.mxu0 %v5200_v53  ;;  %v5280_v53 = vld [vmem:[#allocation8 + $0x2cc] ss:$16 sps:$4 sm:$0xff]  }
 0x1db   :  { %3591 = vmatprep.subr.bf16.mxu0 %v5208_v55  ;;  %v5319_v55 = vld [vmem:[#allocation8 + $0x3a4] ss:$16 sps:$4 sm:$0xff]  }
 0x1de   :  { %3592 = vmatpush1.bf16.msra.mxu0 %v5206_v56  ;;  %v5278_v56 = vld [vmem:[#allocation8 + $0x2c8] ss:$16 sps:$4 sm:$0xff]  }
 0x1df   :  { %3593 = vmatprep.subr.bf16.mxu0 %v5214_v43  ;;  %v5286_v43 = vld [vmem:[#allocation8 + $0x2ec] ss:$16 sps:$4 sm:$0xff]  }
 0x1e1   :  { %v5464_v58 = vpop.eup %5463 }
 0x1e2   :  { %v5466_v59 = vpop.eup %5465  ;;  %3594 = vmatpush1.bf16.msra.mxu0 %v5212_v57  ;;  %v2274_v0 = vpack.c.bf16 %v5464_v58, %v5464_v58  ;;  %v5317_v57 = vld [vmem:[#allocation8 + $0x3a0] ss:$16 sps:$4 sm:$0xff]   ;;  %v5284_v58 = vld [vmem:[#allocation8 + $0x2e8] ss:$16 sps:$4 sm:$0xff]  }
 0x1e3   :  { %v2275_v61 = vpack.c.bf16 %v5466_v59, %v5466_v59  ;;  %3595 = vmatprep.subr.bf16.mxu0 %v5220_v44  ;;  %v5325_v44 = vld [vmem:[#allocation8 + $0x3c4] ss:$16 sps:$4 sm:$0xff]   ;;  %v5292_v59 = vld [vmem:[#allocation8 + $0x30c] ss:$16 sps:$4 sm:$0xff]  }
 0x1e5   :  { %3486 = vmatprep.mubr.bf16.mxu1 %v2275_v61  ;;  %3609 = vmatprep.mubr.bf16.mxu0 %v2275_v61  ;;  %v5331_v61 = vld [vmem:[#allocation8 + $0x3e4] ss:$16 sps:$4 sm:$0xff]  }
 0x1e6   :  { %3487 = vmatmul.mubr.bf16.vlgmr.msra.gmra.mrb[8].mxu1 %v2274_v0  ;;  %3596 = vmatpush1.bf16.msra.mxu0 %v5218_v60  ;;  %v5323_v60 = vld [vmem:[#allocation8 + $0x3c0] ss:$16 sps:$4 sm:$0xff]  }
 0x1e7   :  { %3597 = vmatprep.subr.bf16.mxu0 %v5223_v62  ;;  %3496 = vmatpush1.bf16.msra.mxu1 %v5239_v63  ;;  %v5290_v62 = vld [vmem:[#allocation8 + $0x308] ss:$16 sps:$4 sm:$0xff]   ;;  %v5298_v63 = vld [vmem:[#allocation8 + $0x32c] ss:$16 sps:$4 sm:$0xff]  }
 0x1e8   :  { %3497 = vmatprep.subr.bf16.mxu1 %v5247_v1  ;;  %v5337_v1 = vld [vmem:[#allocation8 + $0x404] ss:$16 sps:$4 sm:$0xff]  }
 0x1ea   :  { %3598 = vmatpush1.bf16.msra.mxu0 %v5221_v2  ;;  %v5296_v2 = vld [vmem:[#allocation8 + $0x328] ss:$16 sps:$4 sm:$0xff]  }
 0x1eb   :  { %3599 = vmatprep.subr.bf16.mxu0 %v5226_v3  ;;  %3498 = vmatpush1.bf16.msra.mxu1 %v5245_v4  ;;  %v5304_v3 = vld [vmem:[#allocation8 + $0x34c] ss:$16 sps:$4 sm:$0xff]   ;;  %v5302_v4 = vld [vmem:[#allocation8 + $0x348] ss:$16 sps:$4 sm:$0xff]  }
 0x1ec   :  { %3499 = vmatprep.subr.bf16.mxu1 %v5253_v5  ;;  %v5310_v5 = vld [vmem:[#allocation8 + $0x36c] ss:$16 sps:$4 sm:$0xff]  }
 0x1ee   :  { %3600 = vmatpush1.bf16.msra.mxu0 %v5224_v8  ;;  %v5308_v8 = vld [vmem:[#allocation8 + $0x368] ss:$16 sps:$4 sm:$0xff]  }
 0x1ef   :  { %3601 = vmatprep.subr.bf16.mxu0 %v5229_v9  ;;  %3500 = vmatpush1.bf16.msra.mxu1 %v5251_v10  ;;  %v5316_v9 = vld [vmem:[#allocation8 + $0x38c] ss:$16 sps:$4 sm:$0xff]   ;;  %v5314_v10 = vld [vmem:[#allocation8 + $0x388] ss:$16 sps:$4 sm:$0xff]  }
 0x1f0   :  { %3501 = vmatprep.subr.bf16.mxu1 %v5259_v11  ;;  %v5322_v11 = vld [vmem:[#allocation8 + $0x3ac] ss:$16 sps:$4 sm:$0xff]  }
 0x1f2   :  { %3602 = vmatpush1.bf16.msra.mxu0 %v5227_v12  ;;  %v5320_v12 = vld [vmem:[#allocation8 + $0x3a8] ss:$16 sps:$4 sm:$0xff]  }
 0x1f3   :  { %3603 = vmatprep.subr.bf16.mxu0 %v5232_v13  ;;  %3502 = vmatpush1.bf16.msra.mxu1 %v5257_v15  ;;  %v5328_v13 = vld [vmem:[#allocation8 + $0x3cc] ss:$16 sps:$4 sm:$0xff]   ;;  %v5326_v15 = vld [vmem:[#allocation8 + $0x3c8] ss:$16 sps:$4 sm:$0xff]  }
 0x1f4   :  { %3503 = vmatprep.subr.bf16.mxu1 %v5265_v16  ;;  %v5334_v16 = vld [vmem:[#allocation8 + $0x3ec] ss:$16 sps:$4 sm:$0xff]  }
 0x1f6   :  { %3604 = vmatpush1.bf16.msra.mxu0 %v5230_v17  ;;  %v5332_v17 = vld [vmem:[#allocation8 + $0x3e8] ss:$16 sps:$4 sm:$0xff]  }
 0x1f7   :  { %3605 = vmatprep.subr.bf16.mxu0 %v5235_v18  ;;  %3504 = vmatpush1.bf16.msra.mxu1 %v5263_v19  ;;  %v5340_v18 = vld [vmem:[#allocation8 + $0x40c] ss:$16 sps:$4 sm:$0xff]   ;;  %v418_v19 = vsub.s32 2, %v5843_v32 }
 0x1f8   :  { %3505 = vmatprep.subr.bf16.mxu1 %v5271_v20  ;;  %v422_v20 = vsub.s32 3, %v5843_v32 }
 0x1fa   :  { %3606 = vmatpush1.bf16.msra.mxu0 %v5233_v21  ;;  %v419_v21 = vrot.slane %v5846_v51, %v418_v19 }
 0x1fb   :  { %3607 = vmatprep.subr.bf16.mxu0 %v5238_v22  ;;  %3506 = vmatpush1.bf16.msra.mxu1 %v5269_v23  ;;  %v423_v22 = vrot.slane %v5846_v51, %v422_v20 }
 0x1fc   :  { %3507 = vmatprep.subr.bf16.mxu1 %v5277_v24 }
 0x1fe   :  { %3608 = vmatpush1.bf16.msra.mxu0 %v5236_v25 }
 0x1ff   :  { %3618 = vmatprep.subr.bf16.mxu0 %v5244_v26  ;;  %3508 = vmatpush1.bf16.msra.mxu1 %v5275_v27 }
 0x200   :  { %3509 = vmatprep.subr.bf16.mxu1 %v5283_v28 }
 0x201   :  { %3610 = vmatmul.mubr.bf16.vlgmr.msra.gmra.mrb[8].mxu0 %v2274_v0  ;;  %v5329_v0 = vld [vmem:[#allocation8 + $0x3e0] ss:$16 sps:$4 sm:$0xff]  }
 0x202   :  { %3619 = vmatpush1.bf16.msra.mxu0 %v5242_v29 }
 0x203   :  { %3620 = vmatprep.subr.bf16.mxu0 %v5250_v30  ;;  %3510 = vmatpush1.bf16.msra.mxu1 %v5281_v6 }
 0x204   :  { %3511 = vmatprep.subr.bf16.mxu1 %v5289_v31  ;;  %v5335_v31 = vld [vmem:[#allocation8 + $0x400] ss:$16 sps:$4 sm:$0xff]  }
 0x206   :  { %3621 = vmatpush1.bf16.msra.mxu0 %v5248_v47  ;;  %v5338_v47 = vld [vmem:[#allocation8 + $0x408] ss:$16 sps:$4 sm:$0xff]  }
 0x207   :  { %3622 = vmatprep.subr.bf16.mxu0 %v5256_v7  ;;  %3512 = vmatpush1.bf16.msra.mxu1 %v5287_v33  ;;  %v5343_v33 = vld [vmem:[#allocation8 + $0x424] ss:$16 sps:$4 sm:$0xff]  }
 0x208   :  { %3513 = vmatprep.subr.bf16.mxu1 %v5295_v36  ;;  %v5346_v36 = vld [vmem:[#allocation8 + $0x42c] ss:$16 sps:$4 sm:$0xff]  }
 0x20a   :  { %3623 = vmatpush1.bf16.msra.mxu0 %v5254_v37  ;;  %v5341_v37 = vld [vmem:[#allocation8 + $0x420] ss:$16 sps:$4 sm:$0xff]  }
 0x20b   :  { %3624 = vmatprep.subr.bf16.mxu0 %v5262_v34  ;;  %3514 = vmatpush1.bf16.msra.mxu1 %v5293_v38  ;;  %v5344_v34 = vld [vmem:[#allocation8 + $0x428] ss:$16 sps:$4 sm:$0xff]   ;;  %v5349_v38 = vld [vmem:[#allocation8 + $0x444] ss:$16 sps:$4 sm:$0xff]  }
 0x20c   :  { %3515 = vmatprep.subr.bf16.mxu1 %v5301_v39  ;;  %v5352_v39 = vld [vmem:[#allocation8 + $0x44c] ss:$16 sps:$4 sm:$0xff]  }
 0x20e   :  { %3625 = vmatpush1.bf16.msra.mxu0 %v5260_v40  ;;  %v5347_v40 = vld [vmem:[#allocation8 + $0x440] ss:$16 sps:$4 sm:$0xff]  }
 0x20f   :  { %3626 = vmatprep.subr.bf16.mxu0 %v5268_v41  ;;  %3516 = vmatpush1.bf16.msra.mxu1 %v5299_v42  ;;  %v5350_v41 = vld [vmem:[#allocation8 + $0x448] ss:$16 sps:$4 sm:$0xff]   ;;  %v5355_v42 = vld [vmem:[#allocation8 + $0x464] ss:$16 sps:$4 sm:$0xff]  }
 0x210   :  { %3517 = vmatprep.subr.bf16.mxu1 %v5307_v45  ;;  %v5358_v45 = vld [vmem:[#allocation8 + $0x46c] ss:$16 sps:$4 sm:$0xff]  }
 0x212   :  { %3627 = vmatpush1.bf16.msra.mxu0 %v5266_v46  ;;  %v5353_v46 = vld [vmem:[#allocation8 + $0x460] ss:$16 sps:$4 sm:$0xff]  }
 0x213   :  { %3628 = vmatprep.subr.bf16.mxu0 %v5274_v48  ;;  %3518 = vmatpush1.bf16.msra.mxu1 %v5305_v49  ;;  %v5356_v48 = vld [vmem:[#allocation8 + $0x468] ss:$16 sps:$4 sm:$0xff]   ;;  %v5361_v49 = vld [vmem:[#allocation8 + $0x484] ss:$16 sps:$4 sm:$0xff]  }
 0x214   :  { %3519 = vmatprep.subr.bf16.mxu1 %v5313_v50  ;;  %v5364_v50 = vld [vmem:[#allocation8 + $0x48c] ss:$16 sps:$4 sm:$0xff]  }
 0x216   :  { %3629 = vmatpush1.bf16.msra.mxu0 %v5272_v52  ;;  %v5359_v52 = vld [vmem:[#allocation8 + $0x480] ss:$16 sps:$4 sm:$0xff]  }
 0x217   :  { %3630 = vmatprep.subr.bf16.mxu0 %v5280_v53  ;;  %3520 = vmatpush1.bf16.msra.mxu1 %v5311_v54  ;;  %v5362_v53 = vld [vmem:[#allocation8 + $0x488] ss:$16 sps:$4 sm:$0xff]   ;;  %v5367_v54 = vld [vmem:[#allocation8 + $0x4a4] ss:$16 sps:$4 sm:$0xff]  }
 0x218   :  { %3521 = vmatprep.subr.bf16.mxu1 %v5319_v55  ;;  %v5370_v55 = vld [vmem:[#allocation8 + $0x4ac] ss:$16 sps:$4 sm:$0xff]  }
 0x21a   :  { %3631 = vmatpush1.bf16.msra.mxu0 %v5278_v56  ;;  %v5365_v56 = vld [vmem:[#allocation8 + $0x4a0] ss:$16 sps:$4 sm:$0xff]  }
 0x21b   :  { %3632 = vmatprep.subr.bf16.mxu0 %v5286_v43  ;;  %3522 = vmatpush1.bf16.msra.mxu1 %v5317_v57  ;;  %v5368_v43 = vld [vmem:[#allocation8 + $0x4a8] ss:$16 sps:$4 sm:$0xff]   ;;  %v5373_v57 = vld [vmem:[#allocation8 + $0x4c4] ss:$16 sps:$4 sm:$0xff]  }
 0x21c   :  { %3523 = vmatprep.subr.bf16.mxu1 %v5325_v44  ;;  %v5376_v44 = vld [vmem:[#allocation8 + $0x4cc] ss:$16 sps:$4 sm:$0xff]  }
 0x21e   :  { %3633 = vmatpush1.bf16.msra.mxu0 %v5284_v58  ;;  %v5371_v58 = vld [vmem:[#allocation8 + $0x4c0] ss:$16 sps:$4 sm:$0xff]  }
 0x21f   :  { %3634 = vmatprep.subr.bf16.mxu0 %v5292_v59  ;;  %3524 = vmatpush1.bf16.msra.mxu1 %v5323_v60  ;;  %v5374_v59 = vld [vmem:[#allocation8 + $0x4c8] ss:$16 sps:$4 sm:$0xff]   ;;  %v5379_v60 = vld [vmem:[#allocation8 + $0x4e4] ss:$16 sps:$4 sm:$0xff]  }
 0x220   :  { %3525 = vmatprep.subr.bf16.mxu1 %v5331_v61  ;;  %v5382_v61 = vld [vmem:[#allocation8 + $0x4ec] ss:$16 sps:$4 sm:$0xff]  }
 0x222   :  { %3635 = vmatpush1.bf16.msra.mxu0 %v5290_v62  ;;  %v5377_v62 = vld [vmem:[#allocation8 + $0x4e0] ss:$16 sps:$4 sm:$0xff]  }
 0x223   :  { %3636 = vmatprep.subr.bf16.mxu0 %v5298_v63  ;;  %3526 = vmatpush1.bf16.msra.mxu1 %v5329_v0  ;;  %v5380_v63 = vld [vmem:[#allocation8 + $0x4e8] ss:$16 sps:$4 sm:$0xff]   ;;  %v5385_v0 = vld [vmem:[#allocation8 + $0x504] ss:$16 sps:$4 sm:$0xff]  }
 0x224   :  { %3536 = vmatprep.subr.bf16.mxu1 %v5337_v1  ;;  %v5388_v1 = vld [vmem:[#allocation8 + $0x50c] ss:$16 sps:$4 sm:$0xff]  }
 0x226   :  { %3637 = vmatpush1.bf16.msra.mxu0 %v5296_v2  ;;  %v5383_v2 = vld [vmem:[#allocation8 + $0x500] ss:$16 sps:$4 sm:$0xff]  }
 0x227   :  { %3638 = vmatprep.subr.bf16.mxu0 %v5304_v3  ;;  %v5386_v3 = vld [vmem:[#allocation8 + $0x508] ss:$16 sps:$4 sm:$0xff]  }
 0x22a   :  { %3639 = vmatpush1.bf16.msra.mxu0 %v5302_v4  ;;  %v5391_v4 = vld [vmem:[#allocation8 + $0x524] ss:$16 sps:$4 sm:$0xff]  }
 0x22b   :  { %3640 = vmatprep.subr.bf16.mxu0 %v5310_v5  ;;  %v5394_v5 = vld [vmem:[#allocation8 + $0x52c] ss:$16 sps:$4 sm:$0xff]  }
 0x22e   :  { %3641 = vmatpush1.bf16.msra.mxu0 %v5308_v8  ;;  %v5389_v8 = vld [vmem:[#allocation8 + $0x520] ss:$16 sps:$4 sm:$0xff]  }
 0x22f   :  { %3642 = vmatprep.subr.bf16.mxu0 %v5316_v9  ;;  %v5392_v9 = vld [vmem:[#allocation8 + $0x528] ss:$16 sps:$4 sm:$0xff]  }
 0x232   :  { %3643 = vmatpush1.bf16.msra.mxu0 %v5314_v10  ;;  %v5397_v10 = vld [vmem:[#allocation8 + $0x544] ss:$16 sps:$4 sm:$0xff]  }
 0x233   :  { %3644 = vmatprep.subr.bf16.mxu0 %v5322_v11  ;;  %v5400_v11 = vld [vmem:[#allocation8 + $0x54c] ss:$16 sps:$4 sm:$0xff]  }
 0x236   :  { %3645 = vmatpush1.bf16.msra.mxu0 %v5320_v12  ;;  %v5395_v12 = vld [vmem:[#allocation8 + $0x540] ss:$16 sps:$4 sm:$0xff]  }
 0x237   :  { %3646 = vmatprep.subr.bf16.mxu0 %v5328_v13  ;;  %v5398_v13 = vld [vmem:[#allocation8 + $0x548] ss:$16 sps:$4 sm:$0xff]  }
 0x23a   :  { %3647 = vmatpush1.bf16.msra.mxu0 %v5326_v15  ;;  %v5403_v15 = vld [vmem:[#allocation8 + $0x564] ss:$16 sps:$4 sm:$0xff]  }
 0x23b   :  { %3648 = vmatprep.subr.bf16.mxu0 %v5334_v16  ;;  %v5406_v16 = vld [vmem:[#allocation8 + $0x56c] ss:$16 sps:$4 sm:$0xff]  }
 0x23e   :  { %3649 = vmatpush1.bf16.msra.mxu0 %v5332_v17  ;;  %v426_v17 = vsub.s32 4, %v5843_v32 }
 0x23f   :  { %3659 = vmatprep.subr.bf16.mxu0 %v5340_v18  ;;  %v430_v18 = vsub.s32 5, %v5843_v32 }
 0x253   :  { %v2138_v23 = vpop.f32.mrb[4].mxu1 }
 0x254   :  { %v4647_v24 = vadd.f32 %v2138_v23, %v419_v21  ;;  %v2140_v25 = vpop.f32.mrb[5].mxu1  ;;  %v5401_v21 = vld [vmem:[#allocation8 + $0x560] ss:$16 sps:$4 sm:$0xff]   ;;  %v5409_v23 = vld [vmem:[#allocation8 + $0x584] ss:$16 sps:$4 sm:$0xff]  }
 0x255   :  { %v4648_v26 = vadd.f32 %v2140_v25, %v423_v22  ;;  %v2142_v27 = vpop.f32.mrb[6].mxu1  ;;  %v5404_v22 = vld [vmem:[#allocation8 + $0x568] ss:$16 sps:$4 sm:$0xff]   ;;  %v427_v25 = vrot.slane %v5846_v51, %v426_v17 }
 0x256   :  { %5467 = vtanh.f32 %v4647_v24  ;;  %v2143_v28 = vpop.f32.mrb[7].mxu1  ;;  %v5412_v24 = vld [vmem:[#allocation8 + $0x58c] ss:$16 sps:$4 sm:$0xff]   ;;  %v5407_v27 = vld [vmem:[#allocation8 + $0x580] ss:$16 sps:$4 sm:$0xff]  }
 0x257   :  { %5469 = vtanh.f32 %v4648_v26  ;;  %v431_v26 = vrot.slane %v5846_v51, %v430_v18  ;;  %v5410_v28 = vld [vmem:[#allocation8 + $0x588] ss:$16 sps:$4 sm:$0xff]   ;;  %v5421_v51 = vld [vmem:[#allocation8 + $0x5c4] ss:$16 sps:$4 sm:$0xff]  }
 0x260   :  { %v5468_v29 = vpop.eup %5467 }
 0x261   :  { %v5470_v30 = vpop.eup %5469  ;;  %v2276_v7 = vpack.c.bf16 %v5468_v29, %v5468_v29 }
 0x262   :  { %v2277_v6 = vpack.c.bf16 %v5470_v30, %v5470_v30  ;;  %v5415_v30 = vld [vmem:[#allocation8 + $0x5a4] ss:$16 sps:$4 sm:$0xff]  }
 0x264   :  { %3527 = vmatprep.mubr.bf16.mxu1 %v2277_v6  ;;  %3650 = vmatprep.mubr.bf16.mxu0 %v2277_v6  ;;  %v5418_v6 = vld [vmem:[#allocation8 + $0x5ac] ss:$16 sps:$4 sm:$0xff]  }
 0x265   :  { %3528 = vmatmul.mubr.bf16.vlgmr.msra.gmra.mrb[8].mxu1 %v2276_v7  ;;  %3651 = vmatmul.mubr.bf16.vlgmr.msra.gmra.mrb[8].mxu0 %v2276_v7 }
 0x266   :  { %3537 = vmatpush1.bf16.msra.mxu1 %v5335_v31  ;;  %3660 = vmatpush1.bf16.msra.mxu0 %v5338_v47 }
 0x267   :  { %3538 = vmatprep.subr.bf16.mxu1 %v5343_v33  ;;  %3661 = vmatprep.subr.bf16.mxu0 %v5346_v36 }
 0x26a   :  { %3539 = vmatpush1.bf16.msra.mxu1 %v5341_v37  ;;  %3662 = vmatpush1.bf16.msra.mxu0 %v5344_v34  ;;  %v5413_v37 = vld [vmem:[#allocation8 + $0x5a0] ss:$16 sps:$4 sm:$0xff]   ;;  %v5416_v34 = vld [vmem:[#allocation8 + $0x5a8] ss:$16 sps:$4 sm:$0xff]  }
 0x26b   :  { %3540 = vmatprep.subr.bf16.mxu1 %v5349_v38  ;;  %3663 = vmatprep.subr.bf16.mxu0 %v5352_v39  ;;  %v5424_v38 = vld [vmem:[#allocation8 + $0x5cc] ss:$16 sps:$4 sm:$0xff]   ;;  %v5419_v39 = vld [vmem:[#allocation8 + $0x5c0] ss:$16 sps:$4 sm:$0xff]  }
 0x26e   :  { %3541 = vmatpush1.bf16.msra.mxu1 %v5347_v40  ;;  %3664 = vmatpush1.bf16.msra.mxu0 %v5350_v41  ;;  %v5422_v40 = vld [vmem:[#allocation8 + $0x5c8] ss:$16 sps:$4 sm:$0xff]   ;;  %v5427_v41 = vld [vmem:[#allocation8 + $0x5e4] ss:$16 sps:$4 sm:$0xff]  }
 0x26f   :  { %3542 = vmatprep.subr.bf16.mxu1 %v5355_v42  ;;  %3665 = vmatprep.subr.bf16.mxu0 %v5358_v45  ;;  %v5430_v42 = vld [vmem:[#allocation8 + $0x5ec] ss:$16 sps:$4 sm:$0xff]   ;;  %v5425_v45 = vld [vmem:[#allocation8 + $0x5e0] ss:$16 sps:$4 sm:$0xff]  }
 0x272   :  { %3543 = vmatpush1.bf16.msra.mxu1 %v5353_v46  ;;  %3666 = vmatpush1.bf16.msra.mxu0 %v5356_v48  ;;  %v5428_v46 = vld [vmem:[#allocation8 + $0x5e8] ss:$16 sps:$4 sm:$0xff]  }
 0x273   :  { %3544 = vmatprep.subr.bf16.mxu1 %v5361_v49  ;;  %3667 = vmatprep.subr.bf16.mxu0 %v5364_v50  ;;  %v5431_v48 = vld [vmem:[#allocation11 + $0x40] sm:$0xff]  }
 0x276   :  { %3545 = vmatpush1.bf16.msra.mxu1 %v5359_v52  ;;  %3668 = vmatpush1.bf16.msra.mxu0 %v5362_v53  ;;  %v5432_v53 = vld [vmem:[#allocation11] sm:$0xff]  }
 0x277   :  { %3546 = vmatprep.subr.bf16.mxu1 %v5367_v54  ;;  %3669 = vmatprep.subr.bf16.mxu0 %v5370_v55  ;;  %v5433_v55 = vld [vmem:[#allocation11 + $0x48] sm:$0xff]  }
 0x27a   :  { %3547 = vmatpush1.bf16.msra.mxu1 %v5365_v56  ;;  %3670 = vmatpush1.bf16.msra.mxu0 %v5368_v43  ;;  %v5434_v56 = vld [vmem:[#allocation11 + $0x8] sm:$0xff]   ;;  %v5435_v43 = vld [vmem:[#allocation11 + $0x50] sm:$0xff]  }
 0x27b   :  { %3548 = vmatprep.subr.bf16.mxu1 %v5373_v57  ;;  %3671 = vmatprep.subr.bf16.mxu0 %v5376_v44  ;;  %v5436_v57 = vld [vmem:[#allocation11 + $0x10] sm:$0xff]   ;;  %v5437_v44 = vld [vmem:[#allocation11 + $0x58] sm:$0xff]  }
 0x27e   :  { %3549 = vmatpush1.bf16.msra.mxu1 %v5371_v58  ;;  %3672 = vmatpush1.bf16.msra.mxu0 %v5374_v59  ;;  %v5438_v58 = vld [vmem:[#allocation11 + $0x18] sm:$0xff]   ;;  %v5439_v59 = vld [vmem:[#allocation11 + $0x60] sm:$0xff]  }
 0x27f   :  { %3550 = vmatprep.subr.bf16.mxu1 %v5379_v60  ;;  %3673 = vmatprep.subr.bf16.mxu0 %v5382_v61  ;;  %v5440_v60 = vld [vmem:[#allocation11 + $0x20] sm:$0xff]   ;;  %v5441_v61 = vld [vmem:[#allocation11 + $0x68] sm:$0xff]  }
 0x282   :  { %3551 = vmatpush1.bf16.msra.mxu1 %v5377_v62  ;;  %3674 = vmatpush1.bf16.msra.mxu0 %v5380_v63  ;;  %v5442_v62 = vld [vmem:[#allocation11 + $0x28] sm:$0xff]   ;;  %v5443_v63 = vld [vmem:[#allocation11 + $0x70] sm:$0xff]  }
 0x283   :  { %3552 = vmatprep.subr.bf16.mxu1 %v5385_v0  ;;  %3675 = vmatprep.subr.bf16.mxu0 %v5388_v1  ;;  %v5444_v0 = vld [vmem:[#allocation11 + $0x30] sm:$0xff]   ;;  %v5445_v1 = vld [vmem:[#allocation11 + $0x78] sm:$0xff]  }
 0x286   :  { %3553 = vmatpush1.bf16.msra.mxu1 %v5383_v2  ;;  %3676 = vmatpush1.bf16.msra.mxu0 %v5386_v3  ;;  %v5446_v2 = vld [vmem:[#allocation11 + $0x38] sm:$0xff]   ;;  %v5447_v3 = vld [vmem:[#allocation11 + $0xc0] sm:$0xff]  }
 0x287   :  { %3554 = vmatprep.subr.bf16.mxu1 %v5391_v4  ;;  %3677 = vmatprep.subr.bf16.mxu0 %v5394_v5  ;;  %v2472_v4 = vld [vmem:[#allocation10] sm:$0xf] }
 0x288   :  { %v2477_v5 = vrot.slane %v2472_v4, %v410_v35 }
 0x28a   :  { %3555 = vmatpush1.bf16.msra.mxu1 %v5389_v8  ;;  %3678 = vmatpush1.bf16.msra.mxu0 %v5392_v9  ;;  %v2481_v8 = vrot.slane %v2472_v4, %v414_v14  ;;  %v2489_v9 = vrot.slane %v2472_v4, %v422_v20  ;;  %v5450_v20 = vld [vmem:[#allocation11 + $0x88] sm:$0xff]  }
 0x28b   :  { %3556 = vmatprep.subr.bf16.mxu1 %v5397_v10  ;;  %3679 = vmatprep.subr.bf16.mxu0 %v5400_v11 }
 0x28e   :  { %3557 = vmatpush1.bf16.msra.mxu1 %v5395_v12  ;;  %3680 = vmatpush1.bf16.msra.mxu0 %v5398_v13 }
 0x28f   :  { %3558 = vmatprep.subr.bf16.mxu1 %v5403_v15  ;;  %3681 = vmatprep.subr.bf16.mxu0 %v5406_v16 }
 0x292   :  { %3559 = vmatpush1.bf16.msra.mxu1 %v5401_v21  ;;  %3682 = vmatpush1.bf16.msra.mxu0 %v5404_v22 }
 0x293   :  { %3560 = vmatprep.subr.bf16.mxu1 %v5409_v23  ;;  %3683 = vmatprep.subr.bf16.mxu0 %v5412_v24 }
 0x294   :  { %v2261_v29 = vpop.f32.mrb[4].mxu0 }
 0x295   :  { %v4649_v31 = vadd.f32 %v2261_v29, %v427_v25  ;;  %v2263_v47 = vpop.f32.mrb[5].mxu0 }
 0x296   :  { %v4650_v7 = vadd.f32 %v2263_v47, %v431_v26  ;;  %v2265_v33 = vpop.f32.mrb[6].mxu0  ;;  %3561 = vmatpush1.bf16.msra.mxu1 %v5407_v27  ;;  %3684 = vmatpush1.bf16.msra.mxu0 %v5410_v28  ;;  %v5448_v27 = vld [vmem:[#allocation11 + $0x80] sm:$0xff]   ;;  %v5449_v28 = vld [vmem:[#allocation11 + $0xc8] sm:$0xff]   ;;  %v5454_v47 = vld [vmem:[#allocation11 + $0x98] sm:$0xff]  }
 0x297   :  { %5471 = vtanh.f32 %v4649_v31  ;;  %v2266_v36 = vpop.f32.mrb[7].mxu0  ;;  %3562 = vmatprep.subr.bf16.mxu1 %v5415_v30  ;;  %3685 = vmatprep.subr.bf16.mxu0 %v5418_v6  ;;  %v5451_v30 = vld [vmem:[#allocation11 + $0xd0] sm:$0xff]   ;;  %v5453_v31 = vld [vmem:[#allocation11 + $0xd8] sm:$0xff]   ;;  %v5456_v33 = vld [vmem:[#allocation11 + $0xa0] sm:$0xff]  }
 0x298   :  { %5473 = vtanh.f32 %v4650_v7  ;;  %v5452_v6 = vld [vmem:[#allocation11 + $0x90] sm:$0xff]   ;;  %v5455_v7 = vld [vmem:[#allocation11 + $0xe0] sm:$0xff]   ;;  %v5457_v36 = vld [vmem:[#allocation11 + $0xe8] sm:$0xff]  }
 0x29a   :  { %3563 = vmatpush1.bf16.msra.mxu1 %v5413_v37  ;;  %3686 = vmatpush1.bf16.msra.mxu0 %v5416_v34  ;;  %v5458_v37 = vld [vmem:[#allocation11 + $0xa8] sm:$0xff]   ;;  %v2485_v34 = vrot.slane %v2472_v4, %v418_v19  ;;  %v4566_v19 = vld [vmem:[#allocation13] ss:$0 sm:$0xff] }
 0x29b   :  { %3564 = vmatprep.subr.bf16.mxu1 %v5421_v51  ;;  %3687 = vmatprep.subr.bf16.mxu0 %v5424_v38  ;;  %v5459_v51 = vld [vmem:[#allocation11 + $0xf0] sm:$0xff]  }
 0x29c   :  { %v5460_v38 = vld [vmem:[#allocation11 + $0xb0] sm:$0xff]  }
 0x29e   :  { %3565 = vmatpush1.bf16.msra.mxu1 %v5419_v39  ;;  %3688 = vmatpush1.bf16.msra.mxu0 %v5422_v40  ;;  %v5461_v40 = vld [vmem:[#allocation11 + $0xf8] sm:$0xff]  }
 0x29f   :  { %3566 = vmatprep.subr.bf16.mxu1 %v5427_v41  ;;  %3689 = vmatprep.subr.bf16.mxu0 %v5430_v42  ;;  %v5462_v41 = vld [vmem:[#allocation11 + $0xb8] sm:$0xff]  }
 0x2a1   :  { %v5472_v49 = vpop.eup %5471 }
 0x2a2   :  { %v5474_v50 = vpop.eup %5473  ;;  %3567 = vmatpush1.bf16.msra.mxu1 %v5425_v45  ;;  %3690 = vmatpush1.bf16.msra.mxu0 %v5428_v46  ;;  %v2278_v54 = vpack.c.bf16 %v5472_v49, %v5472_v49 }
 0x2a3   :  { %v2279_v52 = vpack.c.bf16 %v5474_v50, %v5474_v50  ;;  %4599 = vmatprep.subr.bf16.mxu1 %v5431_v48 }
 0x2a5   :  { %3568 = vmatprep.mubr.bf16.mxu1 %v2279_v52  ;;  %3691 = vmatprep.mubr.bf16.mxu0 %v2279_v52 }
 0x2a6   :  { %3569 = vmatmul.mubr.bf16.vlgmr.msra.gmra.mrb[8].mxu1 %v2278_v54  ;;  %3692 = vmatmul.mubr.bf16.vlgmr.msra.gmra.mrb[8].mxu0 %v2278_v54 }
 0x2a7   :  { %4600 = vmatpush3.bf16.msra.mxu1 %v5432_v53 }
 0x2a8   :  { %4601 = vmatprep.subr.bf16.mxu1 %v5433_v55 }
 0x2ab   :  { %4602 = vmatpush3.bf16.msra.mxu1 %v5434_v56 }
 0x2ac   :  { %4603 = vmatprep.subr.bf16.mxu1 %v5435_v43 }
 0x2af   :  { %4604 = vmatpush3.bf16.msra.mxu1 %v5436_v57 }
 0x2b0   :  { %4605 = vmatprep.subr.bf16.mxu1 %v5437_v44 }
 0x2b3   :  { %4606 = vmatpush3.bf16.msra.mxu1 %v5438_v58 }
 0x2b4   :  { %4607 = vmatprep.subr.bf16.mxu1 %v5439_v59 }
 0x2b7   :  { %4608 = vmatpush3.bf16.msra.mxu1 %v5440_v60 }
 0x2b8   :  { %4609 = vmatprep.subr.bf16.mxu1 %v5441_v61 }
 0x2bb   :  { %4610 = vmatpush3.bf16.msra.mxu1 %v5442_v62 }
 0x2bc   :  { %4611 = vmatprep.subr.bf16.mxu1 %v5443_v63 }
 0x2bf   :  { %4612 = vmatpush3.bf16.msra.mxu1 %v5444_v0 }
 0x2c0   :  { %4613 = vmatprep.subr.bf16.mxu1 %v5445_v1 }
 0x2c3   :  { %4614 = vmatpush3.bf16.msra.mxu1 %v5446_v2 }
 0x2c4   :  { %4621 = vmatprep.subr.bf16.mxu1 %v5447_v3 }
 0x379   :  { %v3570_v10 = vpop.f32.mrb[8].mxu1  ;;  %v3693_v11 = vpop.f32.mrb[8].mxu0 }
 0x37a   :  { %v4651_v12 = vadd.f32 %v3570_v10, %v2477_v5  ;;  %v3572_v13 = vpop.f32.mrb[9].mxu1  ;;  %v3695_v15 = vpop.f32.mrb[9].mxu0  ;;  %v4653_v39 = vadd.f32 %v3693_v11, %v2485_v34 }
 0x37b   :  { %v4652_v16 = vadd.f32 %v3572_v13, %v2481_v8  ;;  %v4654_v17 = vadd.f32 %v3695_v15, %v2489_v9  ;;  %v3574_v18 = vpop.f32.mrb[10].mxu1  ;;  %v3697_v21 = vpop.f32.mrb[10].mxu0 }
 0x37c   :  { %v3700_v22 = vmax.f32 %v4651_v12, 0.0  ;;  %v3575_v23 = vpop.f32.mrb[11].mxu1  ;;  %v3698_v24 = vpop.f32.mrb[11].mxu0  ;;  %v3702_v42 = vmax.f32 %v4653_v39, 0.0 }
 0x37d   :  { %v3701_v25 = vmax.f32 %v4652_v16, 0.0  ;;  %v3703_v35 = vmax.f32 %v4654_v17, 0.0 }
 0x37e   :  { %v3704_v14 = vpack.c.bf16 %v3700_v22, %v3700_v22  ;;  %v3706_v45 = vpack.c.bf16 %v3702_v42, %v3702_v42 }
 0x37f   :  { %v3705_v26 = vpack.c.bf16 %v3701_v25, %v3701_v25  ;;  %v3707_v29 = vpack.c.bf16 %v3703_v35, %v3703_v35 }
 0x381   :  { %4003 = vmatprep.mubr.bf16.mxu1 %v3705_v26 }
 0x382   :  { %4004 = vmatmul.mubr.bf16.vlgmr.msra.gmra.mrb[12].mxu1 %v3704_v14 }
 0x383   :  { %4622 = vmatpush3.bf16.msra.mxu1 %v5448_v27  ;;  %4043 = vmatprep.mubr.bf16.mxu1 %v3707_v29 }
 0x384   :  { %4623 = vmatprep.subr.bf16.mxu1 %v5449_v28 }
 0x387   :  { %4624 = vmatpush3.bf16.msra.mxu1 %v5450_v20 }
 0x388   :  { %4625 = vmatprep.subr.bf16.mxu1 %v5451_v30 }
 0x38b   :  { %4626 = vmatpush3.bf16.msra.mxu1 %v5452_v6 }
 0x38c   :  { %4627 = vmatprep.subr.bf16.mxu1 %v5453_v31 }
 0x38f   :  { %4628 = vmatpush3.bf16.msra.mxu1 %v5454_v47 }
 0x390   :  { %4629 = vmatprep.subr.bf16.mxu1 %v5455_v7 }
 0x393   :  { %4630 = vmatpush3.bf16.msra.mxu1 %v5456_v33 }
 0x394   :  { %4631 = vmatprep.subr.bf16.mxu1 %v5457_v36 }
 0x397   :  { %4632 = vmatpush3.bf16.msra.mxu1 %v5458_v37 }
 0x398   :  { %4633 = vmatprep.subr.bf16.mxu1 %v5459_v51 }
 0x39b   :  { %4634 = vmatpush3.bf16.msra.mxu1 %v5460_v38 }
 0x39c   :  { %4635 = vmatprep.subr.bf16.mxu1 %v5461_v40 }
 0x39f   :  { %4636 = vmatpush3.bf16.msra.mxu1 %v5462_v41 }
 0x3a2   :  { %4044 = vmatmul.mubr.bf16.vlgmr.msra.gmra.mrb[16].mxu1 %v3706_v45 }
 0x455   :  { %v4615_v46 = vpop.f32.mrb[12].mxu1 }
 0x456   :  { %v4616_v48 = vpop.f32.mrb[13].mxu1 }
 0x457   :  { %v4617_v49 = vadd.f32 %v4616_v48, %v4615_v46  ;;  %v4618_v50 = vpop.f32.mrb[14].mxu1 }
 0x458   :  { %v4619_v32 = vpop.f32.mrb[15].mxu1 }
 0x459   :  { %v4006_v54 = vadd.f32 %v4617_v49, %v4566_v19 }
 0x475   :  { %v4637_v52 = vpop.f32.mrb[16].mxu1 }
 0x476   :  { %v4638_v53 = vpop.f32.mrb[17].mxu1 }
 0x477   :  { %v4639_v55 = vadd.f32 %v4638_v53, %v4637_v52  ;;  %v4640_v56 = vpop.f32.mrb[18].mxu1 }
 0x478   :  { %v4641_v43 = vpop.f32.mrb[19].mxu1 }
 0x479   :  { %v4046_v57 = vadd.f32 %v4639_v55, %v4006_v54 }
 0x47b   :  { %4051 = vmax.xlane.f32.xlu0 %v4046_v57 }
 0x508   :  { %v4052_v44 = vpop.xlane.xlu0 %4051 }
 0x509   :  { %v4053_v58 = vsub.f32 %v4046_v57, %v4052_v44 }
 0x50b   :  { %v4054_v59 = vmul.f32 1.442695, %v4053_v58 }
 0x50d   :  { %5475 = vpow2.f32 %v4054_v59 }
 0x517   :  { %v5476_v60 = vpop.eup %5475 }
 0x518   :  { %4056 = vadd.xlane.f32.xlu0 %v5476_v60 }
 0x5a5   :  { %v4057_v61 = vpop.xlane.xlu0 %4056 }
 0x5a6   :  { %5477 = vlog2.f32 %v4057_v61 }
 0x5b0   :  { %v5478_v62 = vpop.eup %5477 }
 0x5b1   :  { %v4059_v63 = vmul.f32 0.6931472, %v5478_v62 }
 0x5b3   :  { %v4060_v0 = vsub.f32 %v4053_v58, %v4059_v63 }
 0x5b5   :  { %4061 = vst [vmem:[#allocation14] sm:$0xff] %v4060_v0 }
 0x5b6   :  { %5644 = shalt.err (!%p5641_p4)
}
 0x5b7   :  { %s5645_s15 = scalar_lea.hbm %s5896_s7, 128 }
 0x5b8   :  { %p5646_p5 = scmp.ne.s32.totalorder %s5896_s7, %s5645_s15  ;;  %p5649_p6 = scmp.lt.u32.totalorder %s5645_s15, %s5896_s7 }
 0x5ba   :  { %p5651_p7 = pnand %p5649_p6, %p5646_p5 }
 0x5bc   :  { %5654 = shalt.err (!%p5651_p7)
}
 0x5bd   :  { %4071 = dma.vmem_to_hbm [thread:$0]  %s4069_s13, 128, %s5896_s7, [#allocation4]  }
 0x5be   :  { %5663 = dma.done.wait [#allocation4], 128  }
 0x5bf   :  { %5664 = vsyncadd [#allocation4], 4294967168 }
 0x5c0   :  { %4075 = vsyncpa [#allocation3], 1 }
 0x5c1   :  { %4076 = vsyncpa [#allocation6], 1 }
 0x5c2   :  { %4077 = vsyncpa [#allocation9], 1 }
 0x5c3   :  { %4078 = vsyncpa [#allocation12], 1 }
 0x5c4   :  { %4079 = vsyncpa [#allocation4], 1 }

</bundles_post_ra>
